<compile_context>
chip_gen: v7x
topology: tpu7x:2x2x1
jax: 0.10.0
libtpu: 0.0.40
codegen_flags: <defaults>
</compile_context>

<pallas_src>
import math

import jax
import jax.numpy as jnp
from jax import lax
from jax.experimental import pallas as pl
from jax.experimental.pallas import tpu as pltpu


# --------------------------- in-kernel helpers ------------------------------

def _scatter_adj(rows, cols, vals, n_rows, n_cols):
    """Dense (n_rows, n_cols) adjacency from edge lists via one-hot matmuls.

    rows: (1, n_e) int32, cols/vals: (n_e, 1).  Duplicate edges sum, matching
    torch.sparse to_dense coalescing / .at[].add semantics.  Kept in f32 so
    adjacency values are exact.
    """
    n_e = vals.shape[0]
    r_oh_t = jnp.where(
        lax.broadcasted_iota(jnp.int32, (n_rows, n_e), 0) == rows, 1.0, 0.0)
    c_oh = jnp.where(
        lax.broadcasted_iota(jnp.int32, (n_e, n_cols), 1) == cols, 1.0, 0.0)
    return jnp.dot(r_oh_t, c_oh * vals, preferred_element_type=jnp.float32)


def _norm_adj(adj):
    # D_row^-1 @ A @ D_col^-1 with 1/0 -> 0   (DGCD.sparse_adj_norm).
    # Row/col sums as ones-matmuls -> MXU, keeping the XLU free.
    s, e = adj.shape
    rsum = jnp.dot(adj, jnp.ones((e, 1), jnp.float32),
                   preferred_element_type=jnp.float32)          # (S,1)
    csum = jnp.dot(jnp.ones((1, s), jnp.float32), adj,
                   preferred_element_type=jnp.float32)          # (1,E)
    rinv = jnp.where(rsum > 0.0, 1.0 / jnp.where(rsum > 0.0, rsum, 1.0), 0.0)
    cinv = jnp.where(csum > 0.0, 1.0 / jnp.where(csum > 0.0, csum, 1.0), 0.0)
    return adj * rinv * cinv


def _entropy_rows(x):
    """Row-wise softmax entropy / sqrt(K) for a batch of rows (GCNLayer.entropy).

    One batched pass for all live entropies; sums land on the MXU via ones
    matmuls; exp/log2 and divisions stay in f32 (exact divide per review)."""
    k = x.shape[1]
    ones_k = jnp.ones((k, 1), jnp.float32)
    m = jnp.max(x, axis=1, keepdims=True)                       # XLU (unavoidable)
    e = jnp.exp(x - m)
    se = jnp.dot(e, ones_k, preferred_element_type=jnp.float32)
    p = e / se
    plog = p * jnp.log2(p + 1e-10)
    s = jnp.dot(plog, ones_k, preferred_element_type=jnp.float32)
    return -s * (1.0 / math.sqrt(k))


def _bdot(a, b_ref_val):
    # bf16 x bf16 matmul with f32 accumulation (weights pre-cast in wrapper).
    return jnp.dot(a.astype(jnp.bfloat16), b_ref_val,
                   preferred_element_type=jnp.float32)


# ------------------------------ fused kernel --------------------------------

def _dgcd_fused_kernel(rows_t_ref, cols_t_ref, vals_t_ref,
                       rows_f_ref, cols_f_ref, vals_f_ref,
                       class_ref, stu_ref, exer_ref,
                       w12_ref, b12_ref, w35_ref, b35_ref, w4_ref, b4_ref,
                       w35v2_ref, b35s2_ref,
                       exer_raw_ref, dis_raw_ref, kn_ref,
                       pw1_ref, pb1_ref, pw2_ref, pb2_ref, pw3_ref, pb3_ref,
                       out_ref):
    S, K = stu_ref.shape
    E = exer_ref.shape[0]

    class_e = class_ref[...]                                    # (1,K) f32
    stu_e = stu_ref[...]                                        # (S,K) f32
    exer_bf = exer_ref[...].astype(jnp.bfloat16)                # (E,K)

    # ---- adjacency construction (matmul scatter) + normalization, all VMEM ----
    adj_t_n = _norm_adj(_scatter_adj(rows_t_ref[...], cols_t_ref[...],
                                     vals_t_ref[...], S, E))
    adj_f_n = _norm_adj(_scatter_adj(rows_f_ref[...], cols_f_ref[...],
                                     vals_f_ref[...], S, E))

    # ---- GCN layer 1 (only the branches that reach the prediction head) ----
    # One stacked aggregation matmul for both adjacencies.
    adj_cat = jnp.concatenate([adj_t_n, adj_f_n], axis=0).astype(jnp.bfloat16)
    agg = jnp.dot(adj_cat, exer_bf, preferred_element_type=jnp.float32)  # (2S,K)

    # [lin1 | lin2] applied in a single widened matmul, then sliced.
    stu_tf = _bdot(agg, w12_ref[...]) + b12_ref[...]            # (2S,2K)
    stu_t = stu_tf[:S, :K]
    stu_f = stu_tf[S:, K:]

    # mean(stu) via ones-matmul (MXU); mean(lin3(stu)) == lin3(mean(stu)).
    ones_s = jnp.full((1, S), 1.0 / S, jnp.float32)
    mean_stu = jnp.dot(ones_s, stu_e, preferred_element_type=jnp.float32)
    cm = jnp.concatenate([class_e, mean_stu], axis=0)           # (2,K)
    cm35 = _bdot(cm, w35_ref[...]) + b35_ref[...]               # (2,2K): [lin3|lin5]
    c2s = cm35[0:1, :K] * (1.0 / S)                             # lin3(class)/S
    c2c = cm35[0:1, K:]                                         # lin5(class)
    s2c = cm35[1:2, :K]                                         # mean(lin3(stu))

    s2s = _bdot(stu_e, w4_ref[...]) + b4_ref[...]               # (S,K)

    # Batched entropy for the 3 live entropies (c2s, stu_t, stu_f).
    ent = _entropy_rows(jnp.concatenate([c2s, stu_t, stu_f], axis=0))
    c2s_ent = ent[0:1, :]
    stu_t_ent = ent[1:S + 1, :]
    stu_f_ent = ent[S + 1:, :]
    # TODO(synk): as in the reference, an all-zero entropy sum gives 0/0 (NaN);
    # no epsilon is added to preserve the original semantics.
    denom = stu_t_ent + stu_f_ent + c2s_ent
    s1 = (stu_t * (stu_t_ent / denom) + stu_f * (stu_f_ent / denom)
          + c2s * (c2s_ent / denom)) * (1.0 / 3.0) + s2s
    c1 = s2c + c2c

    # ---- GCN layer 2, class path only: mean(lin3_2(s1)) + lin5_2(c1) ----
    mean_s1 = jnp.dot(ones_s, s1, preferred_element_type=jnp.float32)
    mc = jnp.concatenate([mean_s1, c1], axis=1)                 # (1,2K)
    c2 = _bdot(mc, w35v2_ref[...]) + b35s2_ref[...]             # (1,K)

    # ---- prediction head (drop_1 / drop_2 are identity in eval mode) ----
    class_k = jax.nn.sigmoid(c2)                                # (1,K)
    exer_k = jax.nn.sigmoid(exer_raw_ref[...])                  # (T,K)
    exer_dis = jax.nn.sigmoid(dis_raw_ref[...]) * 10.0          # (T,1)
    x = exer_dis * (class_k - exer_k) * kn_ref[...]             # (T,K) f32
    h1 = jnp.tanh(_bdot(x, pw1_ref[...]) + pb1_ref[...])        # (T,256)
    h2 = jnp.tanh(_bdot(h1, pw2_ref[...]) + pb2_ref[...])       # (T,128)
    out_ref[...] = jax.nn.sigmoid(_bdot(h2, pw3_ref[...]) + pb3_ref[...])


# ----------------------------- wrapper / packing -----------------------------

def _pack_conv1(layer):
    (w1, b1), (w2, b2), (w3, b3), (w4, b4), (w5, b5), (_, _) = layer  # w6 unused
    bf = jnp.bfloat16
    w12 = jnp.concatenate([w1.T, w2.T], axis=1).astype(bf)            # (K,2K)
    b12 = jnp.concatenate([b1, b2]).reshape(1, -1).astype(jnp.float32)
    w35 = jnp.concatenate([w3.T, w5.T], axis=1).astype(bf)            # (K,2K)
    b35 = jnp.concatenate([b3, b5]).reshape(1, -1).astype(jnp.float32)
    return (w12, b12, w35, b35, w4.T.astype(bf),
            b4.reshape(1, -1).astype(jnp.float32))


def _pack_conv2(layer):
    # Layer-2 class path only needs linear3 / linear5.
    (_, _), (_, _), (w3, b3), (_, _), (w5, b5), (_, _) = layer
    w35v = jnp.concatenate([w3.T, w5.T], axis=0).astype(jnp.bfloat16)  # (2K,K)
    b35s = (b3 + b5).reshape(1, -1).astype(jnp.float32)
    return (w35v, b35s)


def _pack_prednet(p):
    (w1, b1), (w2, b2), (w3, b3) = p
    bf = jnp.bfloat16
    return (w1.T.astype(bf), b1.reshape(1, -1).astype(jnp.float32),
            w2.T.astype(bf), b2.reshape(1, -1).astype(jnp.float32),
            w3.T.astype(bf), b3.reshape(1, -1).astype(jnp.float32))


def dgcd_fused(edge_t, vals_t, edge_f, vals_f, class_emb, stu_e, exer_e,
               conv1_packed, conv2_packed, exer_raw, dis_raw, kn, pred_packed):
    t_out = exer_raw.shape[0]
    S, K = stu_e.shape
    E = exer_e.shape[0]

    rows_t = edge_t[0].astype(jnp.int32).reshape(1, -1)
    cols_t = edge_t[1].astype(jnp.int32).reshape(-1, 1)
    vt = vals_t.astype(jnp.float32).reshape(-1, 1)
    rows_f = edge_f[0].astype(jnp.int32).reshape(1, -1)
    cols_f = edge_f[1].astype(jnp.int32).reshape(-1, 1)
    vf = vals_f.astype(jnp.float32).reshape(-1, 1)

    args = (rows_t, cols_t, vt, rows_f, cols_f, vf,
            class_emb.astype(jnp.float32), stu_e.astype(jnp.float32),
            exer_e.astype(jnp.float32),
            *conv1_packed, *conv2_packed,
            exer_raw.astype(jnp.float32), dis_raw.astype(jnp.float32),
            kn.astype(jnp.float32), *pred_packed)

    n_et, n_ef = rows_t.shape[1], rows_f.shape[1]
    arg_bytes = sum(int(a.size) * a.dtype.itemsize for a in args) + t_out * 4
    flops = 2 * (S * n_et * E + S * n_ef * E            # one-hot scatters
                 + 4 * S * E                            # degree sums
                 + 2 * S * E * K                        # stacked aggregation
                 + 2 * S * K * 2 * K + S * K * K        # layer-1 linears
                 + 2 * S * K                            # row means
                 + 2 * (2 * S + 1) * K                  # entropy sums
                 + 2 * K * K                            # layer-2 class path
                 + t_out * (K * 256 + 256 * 128 + 128))
    transcendentals = 2 * (2 * S + 1) * K + t_out * (2 * K + 256 + 128 + 2) + K
    cost = pl.CostEstimate(flops=int(flops), transcendentals=int(transcendentals),
                           bytes_accessed=int(arg_bytes))

    # Explicit VMEM budget (review, v7x): footprint + headroom, capped well
    # below v7x's 64 MiB physical VMEM.
    adj_scratch = 6 * S * E * 4 + t_out * (256 + 128 + K) * 4
    vmem_limit = int(min(48 * 2 ** 20, max(32 * 2 ** 20, 8 * (arg_bytes + adj_scratch))))

    vmem = pl.BlockSpec(memory_space=pltpu.MemorySpace.VMEM)
    return pl.pallas_call(
        _dgcd_fused_kernel,
        out_shape=jax.ShapeDtypeStruct((t_out, 1), jnp.float32),
        in_specs=[vmem] * len(args),
        out_specs=vmem,
        compiler_params=pltpu.CompilerParams(vmem_limit_bytes=vmem_limit),
        cost_estimate=cost,
    )(*args)


# ----------------------------- model (glue) ---------------------------------

def relaxed_bernoulli_rsample(key, probs, temperature):
    # Matches torch RelaxedBernoulli.rsample (probs clamped as in clamp_probs).
    eps = float(jnp.finfo(jnp.float32).eps)
    probs = jnp.clip(probs, eps, 1.0 - eps)
    u = jax.random.uniform(key, probs.shape, minval=eps, maxval=1.0 - eps)
    logits = jnp.log(probs) - jnp.log1p(-probs)
    noise = jnp.log(u) - jnp.log1p(-u)
    return jax.nn.sigmoid((logits + noise) / temperature)


def dgcd_testforward(params, edge_t, edge_f, class_id, stu_list, exer_list,
                     kn_emb, exer_test, key, pi):
    class_emb = params["class_emb"][class_id][None, :]           # (1, K)
    stu_embeddings = params["stu_emb"][stu_list]                 # (S, K)
    exer_embeddings = params["exer_diff"][exer_list]             # (E, K)

    # Edge scores -> RelaxedBernoulli samples (tiny lane-sparse work + RNG; XLA).
    mu_w, mu_b = params["mu"]
    comb_t = jnp.concatenate([stu_embeddings[edge_t[0]],
                              exer_embeddings[edge_t[1]]], axis=1)
    comb_f = jnp.concatenate([stu_embeddings[edge_f[0]],
                              exer_embeddings[edge_f[1]]], axis=1)
    edge_t_p = jax.nn.sigmoid(comb_t @ mu_w.T + mu_b)[:, 0]
    edge_f_p = jax.nn.sigmoid(comb_f @ mu_w.T + mu_b)[:, 0]
    k_t, k_f = jax.random.split(key)
    edge_t_v = relaxed_bernoulli_rsample(k_t, edge_t_p, pi)
    edge_f_v = relaxed_bernoulli_rsample(k_f, edge_f_p, pi)

    exer_raw = params["exer_diff"][exer_test]                    # (T, K)
    dis_raw = params["exer_dis"][exer_test]                      # (T, 1)

    return dgcd_fused(edge_t, edge_t_v, edge_f, edge_f_v,
                      class_emb, stu_embeddings, exer_embeddings,
                      _pack_conv1(params["conv1"]), _pack_conv2(params["conv2"]),
                      exer_raw, dis_raw, kn_emb, _pack_prednet(params["prednet"]))


# ----------------------------- init & main -----------------------------------

def xavier_normal(key, shape):
    fan_out, fan_in = shape
    std = math.sqrt(2.0 / (fan_in + fan_out))
    return (std * jax.random.normal(key, shape)).astype(jnp.float32)


def init_params(key, class_n, stu_n, exer_n, skill_n):
    keys = iter(jax.random.split(key, 64))

    def lin(out_f, in_f):
        w = xavier_normal(next(keys), (out_f, in_f))
        b = 0.01 * jax.random.normal(next(keys), (out_f,), dtype=jnp.float32)
        return (w, b)

    def gcn():
        return tuple(lin(skill_n, skill_n) for _ in range(6))

    return {
        "class_emb": xavier_normal(next(keys), (class_n, skill_n)),
        "stu_emb": xavier_normal(next(keys), (stu_n, skill_n)),
        "exer_diff": xavier_normal(next(keys), (exer_n, skill_n)),
        "exer_dis": xavier_normal(next(keys), (exer_n, 1)),
        "mu": lin(1, 2 * skill_n),
        "logvar": lin(1, 2 * skill_n),
        "conv1": gcn(),
        "conv2": gcn(),
        "prednet": (lin(256, skill_n), lin(128, 256), lin(1, 128)),
    }


if __name__ == "__main__":
    key = jax.random.PRNGKey(0)
    k_param, k_edges, k_kn, k_sample = jax.random.split(key, 4)

    class_n, stu_n, exer_n, skill_n, pi = 3, 10, 12, 32, 0.5
    S, E, T, n_edges = 8, 8, 6, 12

    params = init_params(k_param, class_n, stu_n, exer_n, skill_n)

    ke1, ke2, ke3, ke4 = jax.random.split(k_edges, 4)
    edge_t = (jax.random.randint(ke1, (n_edges,), 0, S),
              jax.random.randint(ke2, (n_edges,), 0, E))
    edge_f = (jax.random.randint(ke3, (n_edges,), 0, S),
              jax.random.randint(ke4, (n_edges,), 0, E))

    class_id = 1
    stu_list = jnp.arange(S, dtype=jnp.int32)
    exer_list = jnp.arange(E, dtype=jnp.int32)
    exer_test = jnp.arange(T, dtype=jnp.int32)
    kn_emb = jax.random.bernoulli(k_kn, 0.5, (T, skill_n)).astype(jnp.float32)

    fwd = jax.jit(dgcd_testforward)
    out = fwd(params, edge_t, edge_f, class_id, stu_list, exer_list,
              kn_emb, exer_test, k_sample, pi)
    out = jax.block_until_ready(out)
    assert out.shape == (T, 1) and bool(jnp.all(jnp.isfinite(out)))
    print("KERNEL_OK")
</pallas_src>

<mosaic_0001>
module attributes {stable_mosaic.version = 11 : i64} {
  func.func @_dgcd_fused_kernel(%arg0: memref<1x12xi32, #tpu.memory_space<vmem>>, %arg1: memref<12x1xi32, #tpu.memory_space<vmem>>, %arg2: memref<12x1xf32, #tpu.memory_space<vmem>>, %arg3: memref<1x12xi32, #tpu.memory_space<vmem>>, %arg4: memref<12x1xi32, #tpu.memory_space<vmem>>, %arg5: memref<12x1xf32, #tpu.memory_space<vmem>>, %arg6: memref<1x32xf32, #tpu.memory_space<vmem>>, %arg7: memref<8x32xf32, #tpu.memory_space<vmem>>, %arg8: memref<8x32xf32, #tpu.memory_space<vmem>>, %arg9: memref<32x64xbf16, #tpu.memory_space<vmem>>, %arg10: memref<1x64xf32, #tpu.memory_space<vmem>>, %arg11: memref<32x64xbf16, #tpu.memory_space<vmem>>, %arg12: memref<1x64xf32, #tpu.memory_space<vmem>>, %arg13: memref<32x32xbf16, #tpu.memory_space<vmem>>, %arg14: memref<1x32xf32, #tpu.memory_space<vmem>>, %arg15: memref<64x32xbf16, #tpu.memory_space<vmem>>, %arg16: memref<1x32xf32, #tpu.memory_space<vmem>>, %arg17: memref<6x32xf32, #tpu.memory_space<vmem>>, %arg18: memref<6x1xf32, #tpu.memory_space<vmem>>, %arg19: memref<6x32xf32, #tpu.memory_space<vmem>>, %arg20: memref<32x256xbf16, #tpu.memory_space<vmem>>, %arg21: memref<1x256xf32, #tpu.memory_space<vmem>>, %arg22: memref<256x128xbf16, #tpu.memory_space<vmem>>, %arg23: memref<1x128xf32, #tpu.memory_space<vmem>>, %arg24: memref<128x1xbf16, #tpu.memory_space<vmem>>, %arg25: memref<1x1xf32, #tpu.memory_space<vmem>>, %arg26: memref<6x1xf32, #tpu.memory_space<vmem>>) attributes {dimension_semantics = [], scalar_prefetch = 0 : i64, scratch_operands = 0 : i64, tpu.core_type = #tpu.core_type<tc>} {
    %c0 = arith.constant 0 : index
    %c0_0 = arith.constant 0 : index
    %0 = vector.load %arg6[%c0, %c0_0] : memref<1x32xf32, #tpu.memory_space<vmem>>, vector<1x32xf32>
    %c0_1 = arith.constant 0 : index
    %c0_2 = arith.constant 0 : index
    %1 = vector.load %arg7[%c0_1, %c0_2] : memref<8x32xf32, #tpu.memory_space<vmem>>, vector<8x32xf32>
    %c0_3 = arith.constant 0 : index
    %c0_4 = arith.constant 0 : index
    %2 = vector.load %arg8[%c0_3, %c0_4] : memref<8x32xf32, #tpu.memory_space<vmem>>, vector<8x32xf32>
    %3 = arith.truncf %2 : vector<8x32xf32> to vector<8x32xbf16>
    %c0_5 = arith.constant 0 : index
    %c0_6 = arith.constant 0 : index
    %4 = vector.load %arg0[%c0_5, %c0_6] : memref<1x12xi32, #tpu.memory_space<vmem>>, vector<1x12xi32>
    %c0_7 = arith.constant 0 : index
    %c0_8 = arith.constant 0 : index
    %5 = vector.load %arg1[%c0_7, %c0_8] : memref<12x1xi32, #tpu.memory_space<vmem>>, vector<12x1xi32>
    %c0_9 = arith.constant 0 : index
    %c0_10 = arith.constant 0 : index
    %6 = vector.load %arg2[%c0_9, %c0_10] : memref<12x1xf32, #tpu.memory_space<vmem>>, vector<12x1xf32>
    %7 = tpu.iota {dimensions = array<i32: 0>} : vector<8x12xi32>
    %8 = vector.broadcast %4 : vector<1x12xi32> to vector<8x12xi32>
    %9 = arith.cmpi eq, %7, %8 : vector<8x12xi32>
    %cst = arith.constant 1.000000e+00 : f32
    %cst_11 = arith.constant 0.000000e+00 : f32
    %10 = vector.broadcast %cst : f32 to vector<8x12xf32>
    %11 = vector.broadcast %cst_11 : f32 to vector<8x12xf32>
    %12 = arith.select %9, %10, %11 : vector<8x12xi1>, vector<8x12xf32>
    %13 = tpu.iota {dimensions = array<i32: 1>} : vector<12x8xi32>
    %14 = vector.broadcast %5 : vector<12x1xi32> to vector<12x8xi32>
    %15 = arith.cmpi eq, %13, %14 : vector<12x8xi32>
    %cst_12 = arith.constant 1.000000e+00 : f32
    %cst_13 = arith.constant 0.000000e+00 : f32
    %16 = vector.broadcast %cst_12 : f32 to vector<12x8xf32>
    %17 = vector.broadcast %cst_13 : f32 to vector<12x8xf32>
    %18 = arith.select %15, %16, %17 : vector<12x8xi1>, vector<12x8xf32>
    %19 = vector.broadcast %6 : vector<12x1xf32> to vector<12x8xf32>
    %20 = arith.mulf %18, %19 : vector<12x8xf32>
    %cst_14 = arith.constant dense<0.000000e+00> : vector<8x8xf32>
    %21 = tpu.matmul %12, %20, %cst_14 {dimension_numbers = #tpu.dot_dimension_numbers<[1], [0], [0], [1], [0, 0, 1, 1], [], []>} : vector<8x12xf32>, vector<12x8xf32>, vector<8x8xf32> -> vector<8x8xf32>
    %cst_15 = arith.constant 1.000000e+00 : f32
    %22 = vector.broadcast %cst_15 : f32 to vector<8x1xf32>
    %cst_16 = arith.constant dense<0.000000e+00> : vector<8x1xf32>
    %23 = tpu.matmul %21, %22, %cst_16 {dimension_numbers = #tpu.dot_dimension_numbers<[1], [0], [0], [1], [0, 0, 1, 1], [], []>} : vector<8x8xf32>, vector<8x1xf32>, vector<8x1xf32> -> vector<8x1xf32>
    %cst_17 = arith.constant 1.000000e+00 : f32
    %24 = vector.broadcast %cst_17 : f32 to vector<1x8xf32>
    %cst_18 = arith.constant dense<0.000000e+00> : vector<1x8xf32>
    %25 = tpu.matmul %24, %21, %cst_18 {dimension_numbers = #tpu.dot_dimension_numbers<[1], [0], [0], [1], [0, 0, 1, 1], [], []>} : vector<1x8xf32>, vector<8x8xf32>, vector<1x8xf32> -> vector<1x8xf32>
    %cst_19 = arith.constant 0.000000e+00 : f32
    %26 = vector.broadcast %cst_19 : f32 to vector<8x1xf32>
    %27 = arith.cmpf ogt, %23, %26 : vector<8x1xf32>
    %cst_20 = arith.constant 0.000000e+00 : f32
    %28 = vector.broadcast %cst_20 : f32 to vector<8x1xf32>
    %29 = arith.cmpf ogt, %23, %28 : vector<8x1xf32>
    %cst_21 = arith.constant 1.000000e+00 : f32
    %30 = vector.broadcast %cst_21 : f32 to vector<8x1xf32>
    %31 = arith.select %29, %23, %30 : vector<8x1xi1>, vector<8x1xf32>
    %cst_22 = arith.constant 1.000000e+00 : f32
    %32 = vector.broadcast %cst_22 : f32 to vector<8x1xf32>
    %33 = arith.divf %32, %31 : vector<8x1xf32>
    %cst_23 = arith.constant 0.000000e+00 : f32
    %34 = vector.broadcast %cst_23 : f32 to vector<8x1xf32>
    %35 = arith.select %27, %33, %34 : vector<8x1xi1>, vector<8x1xf32>
    %cst_24 = arith.constant 0.000000e+00 : f32
    %36 = vector.broadcast %cst_24 : f32 to vector<1x8xf32>
    %37 = arith.cmpf ogt, %25, %36 : vector<1x8xf32>
    %cst_25 = arith.constant 0.000000e+00 : f32
    %38 = vector.broadcast %cst_25 : f32 to vector<1x8xf32>
    %39 = arith.cmpf ogt, %25, %38 : vector<1x8xf32>
    %cst_26 = arith.constant 1.000000e+00 : f32
    %40 = vector.broadcast %cst_26 : f32 to vector<1x8xf32>
    %41 = arith.select %39, %25, %40 : vector<1x8xi1>, vector<1x8xf32>
    %cst_27 = arith.constant 1.000000e+00 : f32
    %42 = vector.broadcast %cst_27 : f32 to vector<1x8xf32>
    %43 = arith.divf %42, %41 : vector<1x8xf32>
    %cst_28 = arith.constant 0.000000e+00 : f32
    %44 = vector.broadcast %cst_28 : f32 to vector<1x8xf32>
    %45 = arith.select %37, %43, %44 : vector<1x8xi1>, vector<1x8xf32>
    %46 = vector.broadcast %35 : vector<8x1xf32> to vector<8x8xf32>
    %47 = arith.mulf %21, %46 : vector<8x8xf32>
    %48 = vector.broadcast %45 : vector<1x8xf32> to vector<8x8xf32>
    %49 = arith.mulf %47, %48 : vector<8x8xf32>
    %c0_29 = arith.constant 0 : index
    %c0_30 = arith.constant 0 : index
    %50 = vector.load %arg3[%c0_29, %c0_30] : memref<1x12xi32, #tpu.memory_space<vmem>>, vector<1x12xi32>
    %c0_31 = arith.constant 0 : index
    %c0_32 = arith.constant 0 : index
    %51 = vector.load %arg4[%c0_31, %c0_32] : memref<12x1xi32, #tpu.memory_space<vmem>>, vector<12x1xi32>
    %c0_33 = arith.constant 0 : index
    %c0_34 = arith.constant 0 : index
    %52 = vector.load %arg5[%c0_33, %c0_34] : memref<12x1xf32, #tpu.memory_space<vmem>>, vector<12x1xf32>
    %53 = tpu.iota {dimensions = array<i32: 0>} : vector<8x12xi32>
    %54 = vector.broadcast %50 : vector<1x12xi32> to vector<8x12xi32>
    %55 = arith.cmpi eq, %53, %54 : vector<8x12xi32>
    %cst_35 = arith.constant 1.000000e+00 : f32
    %cst_36 = arith.constant 0.000000e+00 : f32
    %56 = vector.broadcast %cst_35 : f32 to vector<8x12xf32>
    %57 = vector.broadcast %cst_36 : f32 to vector<8x12xf32>
    %58 = arith.select %55, %56, %57 : vector<8x12xi1>, vector<8x12xf32>
    %59 = tpu.iota {dimensions = array<i32: 1>} : vector<12x8xi32>
    %60 = vector.broadcast %51 : vector<12x1xi32> to vector<12x8xi32>
    %61 = arith.cmpi eq, %59, %60 : vector<12x8xi32>
    %cst_37 = arith.constant 1.000000e+00 : f32
    %cst_38 = arith.constant 0.000000e+00 : f32
    %62 = vector.broadcast %cst_37 : f32 to vector<12x8xf32>
    %63 = vector.broadcast %cst_38 : f32 to vector<12x8xf32>
    %64 = arith.select %61, %62, %63 : vector<12x8xi1>, vector<12x8xf32>
    %65 = vector.broadcast %52 : vector<12x1xf32> to vector<12x8xf32>
    %66 = arith.mulf %64, %65 : vector<12x8xf32>
    %cst_39 = arith.constant dense<0.000000e+00> : vector<8x8xf32>
    %67 = tpu.matmul %58, %66, %cst_39 {dimension_numbers = #tpu.dot_dimension_numbers<[1], [0], [0], [1], [0, 0, 1, 1], [], []>} : vector<8x12xf32>, vector<12x8xf32>, vector<8x8xf32> -> vector<8x8xf32>
    %cst_40 = arith.constant 1.000000e+00 : f32
    %68 = vector.broadcast %cst_40 : f32 to vector<8x1xf32>
    %cst_41 = arith.constant dense<0.000000e+00> : vector<8x1xf32>
    %69 = tpu.matmul %67, %68, %cst_41 {dimension_numbers = #tpu.dot_dimension_numbers<[1], [0], [0], [1], [0, 0, 1, 1], [], []>} : vector<8x8xf32>, vector<8x1xf32>, vector<8x1xf32> -> vector<8x1xf32>
    %cst_42 = arith.constant 1.000000e+00 : f32
    %70 = vector.broadcast %cst_42 : f32 to vector<1x8xf32>
    %cst_43 = arith.constant dense<0.000000e+00> : vector<1x8xf32>
    %71 = tpu.matmul %70, %67, %cst_43 {dimension_numbers = #tpu.dot_dimension_numbers<[1], [0], [0], [1], [0, 0, 1, 1], [], []>} : vector<1x8xf32>, vector<8x8xf32>, vector<1x8xf32> -> vector<1x8xf32>
    %cst_44 = arith.constant 0.000000e+00 : f32
    %72 = vector.broadcast %cst_44 : f32 to vector<8x1xf32>
    %73 = arith.cmpf ogt, %69, %72 : vector<8x1xf32>
    %cst_45 = arith.constant 0.000000e+00 : f32
    %74 = vector.broadcast %cst_45 : f32 to vector<8x1xf32>
    %75 = arith.cmpf ogt, %69, %74 : vector<8x1xf32>
    %cst_46 = arith.constant 1.000000e+00 : f32
    %76 = vector.broadcast %cst_46 : f32 to vector<8x1xf32>
    %77 = arith.select %75, %69, %76 : vector<8x1xi1>, vector<8x1xf32>
    %cst_47 = arith.constant 1.000000e+00 : f32
    %78 = vector.broadcast %cst_47 : f32 to vector<8x1xf32>
    %79 = arith.divf %78, %77 : vector<8x1xf32>
    %cst_48 = arith.constant 0.000000e+00 : f32
    %80 = vector.broadcast %cst_48 : f32 to vector<8x1xf32>
    %81 = arith.select %73, %79, %80 : vector<8x1xi1>, vector<8x1xf32>
    %cst_49 = arith.constant 0.000000e+00 : f32
    %82 = vector.broadcast %cst_49 : f32 to vector<1x8xf32>
    %83 = arith.cmpf ogt, %71, %82 : vector<1x8xf32>
    %cst_50 = arith.constant 0.000000e+00 : f32
    %84 = vector.broadcast %cst_50 : f32 to vector<1x8xf32>
    %85 = arith.cmpf ogt, %71, %84 : vector<1x8xf32>
    %cst_51 = arith.constant 1.000000e+00 : f32
    %86 = vector.broadcast %cst_51 : f32 to vector<1x8xf32>
    %87 = arith.select %85, %71, %86 : vector<1x8xi1>, vector<1x8xf32>
    %cst_52 = arith.constant 1.000000e+00 : f32
    %88 = vector.broadcast %cst_52 : f32 to vector<1x8xf32>
    %89 = arith.divf %88, %87 : vector<1x8xf32>
    %cst_53 = arith.constant 0.000000e+00 : f32
    %90 = vector.broadcast %cst_53 : f32 to vector<1x8xf32>
    %91 = arith.select %83, %89, %90 : vector<1x8xi1>, vector<1x8xf32>
    %92 = vector.broadcast %81 : vector<8x1xf32> to vector<8x8xf32>
    %93 = arith.mulf %67, %92 : vector<8x8xf32>
    %94 = vector.broadcast %91 : vector<1x8xf32> to vector<8x8xf32>
    %95 = arith.mulf %93, %94 : vector<8x8xf32>
    %96 = tpu.concatenate %49, %95 in 0 : vector<8x8xf32>, vector<8x8xf32> -> vector<16x8xf32>
    %97 = arith.truncf %96 : vector<16x8xf32> to vector<16x8xbf16>
    %cst_54 = arith.constant dense<0.000000e+00> : vector<16x32xf32>
    %98 = tpu.matmul %97, %3, %cst_54 {dimension_numbers = #tpu.dot_dimension_numbers<[1], [0], [0], [1], [0, 0, 1, 1], [], []>} : vector<16x8xbf16>, vector<8x32xbf16>, vector<16x32xf32> -> vector<16x32xf32>
    %c0_55 = arith.constant 0 : index
    %c0_56 = arith.constant 0 : index
    %99 = vector.load %arg9[%c0_55, %c0_56] : memref<32x64xbf16, #tpu.memory_space<vmem>>, vector<32x64xbf16>
    %100 = arith.truncf %98 : vector<16x32xf32> to vector<16x32xbf16>
    %cst_57 = arith.constant dense<0.000000e+00> : vector<16x64xf32>
    %101 = tpu.matmul %100, %99, %cst_57 {dimension_numbers = #tpu.dot_dimension_numbers<[1], [0], [0], [1], [0, 0, 1, 1], [], []>} : vector<16x32xbf16>, vector<32x64xbf16>, vector<16x64xf32> -> vector<16x64xf32>
    %c0_58 = arith.constant 0 : index
    %c0_59 = arith.constant 0 : index
    %102 = vector.load %arg10[%c0_58, %c0_59] : memref<1x64xf32, #tpu.memory_space<vmem>>, vector<1x64xf32>
    %103 = vector.broadcast %102 : vector<1x64xf32> to vector<16x64xf32>
    %104 = arith.addf %101, %103 : vector<16x64xf32>
    %105 = vector.extract_strided_slice %104 {offsets = [0, 0], sizes = [8, 32], strides = [1, 1]} : vector<16x64xf32> to vector<8x32xf32>
    %106 = vector.extract_strided_slice %104 {offsets = [8, 32], sizes = [8, 32], strides = [1, 1]} : vector<16x64xf32> to vector<8x32xf32>
    %cst_60 = arith.constant 1.250000e-01 : f32
    %107 = vector.broadcast %cst_60 : f32 to vector<1x8xf32>
    %cst_61 = arith.constant dense<0.000000e+00> : vector<1x32xf32>
    %108 = tpu.matmul %107, %1, %cst_61 {dimension_numbers = #tpu.dot_dimension_numbers<[1], [0], [0], [1], [0, 0, 1, 1], [], []>} : vector<1x8xf32>, vector<8x32xf32>, vector<1x32xf32> -> vector<1x32xf32>
    %109 = tpu.concatenate %0, %108 in 0 : vector<1x32xf32>, vector<1x32xf32> -> vector<2x32xf32>
    %c0_62 = arith.constant 0 : index
    %c0_63 = arith.constant 0 : index
    %110 = vector.load %arg11[%c0_62, %c0_63] : memref<32x64xbf16, #tpu.memory_space<vmem>>, vector<32x64xbf16>
    %111 = arith.truncf %109 : vector<2x32xf32> to vector<2x32xbf16>
    %cst_64 = arith.constant dense<0.000000e+00> : vector<2x64xf32>
    %112 = tpu.matmul %111, %110, %cst_64 {dimension_numbers = #tpu.dot_dimension_numbers<[1], [0], [0], [1], [0, 0, 1, 1], [], []>} : vector<2x32xbf16>, vector<32x64xbf16>, vector<2x64xf32> -> vector<2x64xf32>
    %c0_65 = arith.constant 0 : index
    %c0_66 = arith.constant 0 : index
    %113 = vector.load %arg12[%c0_65, %c0_66] : memref<1x64xf32, #tpu.memory_space<vmem>>, vector<1x64xf32>
    %114 = vector.broadcast %113 : vector<1x64xf32> to vector<2x64xf32>
    %115 = arith.addf %112, %114 : vector<2x64xf32>
    %116 = vector.extract_strided_slice %115 {offsets = [0, 0], sizes = [1, 32], strides = [1, 1]} : vector<2x64xf32> to vector<1x32xf32>
    %cst_67 = arith.constant 1.250000e-01 : f32
    %117 = vector.broadcast %cst_67 : f32 to vector<1x32xf32>
    %118 = arith.mulf %116, %117 : vector<1x32xf32>
    %119 = vector.extract_strided_slice %115 {offsets = [0, 32], sizes = [1, 32], strides = [1, 1]} : vector<2x64xf32> to vector<1x32xf32>
    %120 = vector.extract_strided_slice %115 {offsets = [1, 0], sizes = [1, 32], strides = [1, 1]} : vector<2x64xf32> to vector<1x32xf32>
    %c0_68 = arith.constant 0 : index
    %c0_69 = arith.constant 0 : index
    %121 = vector.load %arg13[%c0_68, %c0_69] : memref<32x32xbf16, #tpu.memory_space<vmem>>, vector<32x32xbf16>
    %122 = arith.truncf %1 : vector<8x32xf32> to vector<8x32xbf16>
    %cst_70 = arith.constant dense<0.000000e+00> : vector<8x32xf32>
    %123 = tpu.matmul %122, %121, %cst_70 {dimension_numbers = #tpu.dot_dimension_numbers<[1], [0], [0], [1], [0, 0, 1, 1], [], []>} : vector<8x32xbf16>, vector<32x32xbf16>, vector<8x32xf32> -> vector<8x32xf32>
    %c0_71 = arith.constant 0 : index
    %c0_72 = arith.constant 0 : index
    %124 = vector.load %arg14[%c0_71, %c0_72] : memref<1x32xf32, #tpu.memory_space<vmem>>, vector<1x32xf32>
    %125 = vector.broadcast %124 : vector<1x32xf32> to vector<8x32xf32>
    %126 = arith.addf %123, %125 : vector<8x32xf32>
    %127 = tpu.concatenate %118, %105, %106 in 0 : vector<1x32xf32>, vector<8x32xf32>, vector<8x32xf32> -> vector<17x32xf32>
    %cst_73 = arith.constant 1.000000e+00 : f32
    %128 = vector.broadcast %cst_73 : f32 to vector<32x1xf32>
    %cst_74 = arith.constant dense<0xFF800000> : vector<17xf32>
    %129 = vector.multi_reduction <maximumf>, %127, %cst_74 [1] : vector<17x32xf32> to vector<17xf32>
    %130 = vector.shape_cast %129 : vector<17xf32> to vector<17x1xf32>
    %131 = vector.broadcast %130 : vector<17x1xf32> to vector<17x32xf32>
    %132 = arith.subf %127, %131 : vector<17x32xf32>
    %133 = math.exp %132 : vector<17x32xf32>
    %cst_75 = arith.constant dense<0.000000e+00> : vector<17x1xf32>
    %134 = tpu.matmul %133, %128, %cst_75 {dimension_numbers = #tpu.dot_dimension_numbers<[1], [0], [0], [1], [0, 0, 1, 1], [], []>} : vector<17x32xf32>, vector<32x1xf32>, vector<17x1xf32> -> vector<17x1xf32>
    %135 = vector.broadcast %134 : vector<17x1xf32> to vector<17x32xf32>
    %136 = arith.divf %133, %135 : vector<17x32xf32>
    %cst_76 = arith.constant 1.000000e-10 : f32
    %137 = vector.broadcast %cst_76 : f32 to vector<17x32xf32>
    %138 = arith.addf %136, %137 : vector<17x32xf32>
    %139 = math.log %138 : vector<17x32xf32>
    %cst_77 = arith.constant 2.000000e+00 : f32
    %140 = math.log %cst_77 : f32
    %141 = vector.broadcast %140 : f32 to vector<17x32xf32>
    %142 = arith.divf %139, %141 : vector<17x32xf32>
    %143 = arith.mulf %136, %142 : vector<17x32xf32>
    %cst_78 = arith.constant dense<0.000000e+00> : vector<17x1xf32>
    %144 = tpu.matmul %143, %128, %cst_78 {dimension_numbers = #tpu.dot_dimension_numbers<[1], [0], [0], [1], [0, 0, 1, 1], [], []>} : vector<17x32xf32>, vector<32x1xf32>, vector<17x1xf32> -> vector<17x1xf32>
    %cst_79 = arith.constant 0.000000e+00 : f32
    %145 = vector.broadcast %cst_79 : f32 to vector<17x1xf32>
    %146 = arith.subf %145, %144 : vector<17x1xf32>
    %cst_80 = arith.constant 0.176776692 : f32
    %147 = vector.broadcast %cst_80 : f32 to vector<17x1xf32>
    %148 = arith.mulf %146, %147 : vector<17x1xf32>
    %149 = vector.extract_strided_slice %148 {offsets = [0, 0], sizes = [1, 1], strides = [1, 1]} : vector<17x1xf32> to vector<1x1xf32>
    %150 = vector.extract_strided_slice %148 {offsets = [1, 0], sizes = [8, 1], strides = [1, 1]} : vector<17x1xf32> to vector<8x1xf32>
    %151 = vector.extract_strided_slice %148 {offsets = [9, 0], sizes = [8, 1], strides = [1, 1]} : vector<17x1xf32> to vector<8x1xf32>
    %152 = arith.addf %150, %151 : vector<8x1xf32>
    %153 = vector.broadcast %149 : vector<1x1xf32> to vector<8x1xf32>
    %154 = arith.addf %152, %153 : vector<8x1xf32>
    %155 = arith.divf %150, %154 : vector<8x1xf32>
    %156 = vector.broadcast %155 : vector<8x1xf32> to vector<8x32xf32>
    %157 = arith.mulf %105, %156 : vector<8x32xf32>
    %158 = arith.divf %151, %154 : vector<8x1xf32>
    %159 = vector.broadcast %158 : vector<8x1xf32> to vector<8x32xf32>
    %160 = arith.mulf %106, %159 : vector<8x32xf32>
    %161 = arith.addf %157, %160 : vector<8x32xf32>
    %162 = vector.broadcast %149 : vector<1x1xf32> to vector<8x1xf32>
    %163 = arith.divf %162, %154 : vector<8x1xf32>
    %164 = vector.broadcast %118 : vector<1x32xf32> to vector<8x32xf32>
    %165 = vector.broadcast %163 : vector<8x1xf32> to vector<8x32xf32>
    %166 = arith.mulf %164, %165 : vector<8x32xf32>
    %167 = arith.addf %161, %166 : vector<8x32xf32>
    %cst_81 = arith.constant 0.333333343 : f32
    %168 = vector.broadcast %cst_81 : f32 to vector<8x32xf32>
    %169 = arith.mulf %167, %168 : vector<8x32xf32>
    %170 = arith.addf %169, %126 : vector<8x32xf32>
    %171 = arith.addf %120, %119 : vector<1x32xf32>
    %cst_82 = arith.constant dense<0.000000e+00> : vector<1x32xf32>
    %172 = tpu.matmul %107, %170, %cst_82 {dimension_numbers = #tpu.dot_dimension_numbers<[1], [0], [0], [1], [0, 0, 1, 1], [], []>} : vector<1x8xf32>, vector<8x32xf32>, vector<1x32xf32> -> vector<1x32xf32>
    %173 = tpu.concatenate %172, %171 in 1 : vector<1x32xf32>, vector<1x32xf32> -> vector<1x64xf32>
    %c0_83 = arith.constant 0 : index
    %c0_84 = arith.constant 0 : index
    %174 = vector.load %arg15[%c0_83, %c0_84] : memref<64x32xbf16, #tpu.memory_space<vmem>>, vector<64x32xbf16>
    %175 = arith.truncf %173 : vector<1x64xf32> to vector<1x64xbf16>
    %cst_85 = arith.constant dense<0.000000e+00> : vector<1x32xf32>
    %176 = tpu.matmul %175, %174, %cst_85 {dimension_numbers = #tpu.dot_dimension_numbers<[1], [0], [0], [1], [0, 0, 1, 1], [], []>} : vector<1x64xbf16>, vector<64x32xbf16>, vector<1x32xf32> -> vector<1x32xf32>
    %c0_86 = arith.constant 0 : index
    %c0_87 = arith.constant 0 : index
    %177 = vector.load %arg16[%c0_86, %c0_87] : memref<1x32xf32, #tpu.memory_space<vmem>>, vector<1x32xf32>
    %178 = arith.addf %176, %177 : vector<1x32xf32>
    %179 = arith.negf %178 : vector<1x32xf32>
    %180 = math.exp %179 : vector<1x32xf32>
    %cst_88 = arith.constant 1.000000e+00 : f32
    %181 = vector.broadcast %cst_88 : f32 to vector<1x32xf32>
    %182 = arith.addf %181, %180 : vector<1x32xf32>
    %183 = arith.divf %181, %182 : vector<1x32xf32>
    %c0_89 = arith.constant 0 : index
    %c0_90 = arith.constant 0 : index
    %184 = vector.load %arg17[%c0_89, %c0_90] : memref<6x32xf32, #tpu.memory_space<vmem>>, vector<6x32xf32>
    %185 = arith.negf %184 : vector<6x32xf32>
    %186 = math.exp %185 : vector<6x32xf32>
    %cst_91 = arith.constant 1.000000e+00 : f32
    %187 = vector.broadcast %cst_91 : f32 to vector<6x32xf32>
    %188 = arith.addf %187, %186 : vector<6x32xf32>
    %189 = arith.divf %187, %188 : vector<6x32xf32>
    %c0_92 = arith.constant 0 : index
    %c0_93 = arith.constant 0 : index
    %190 = vector.load %arg18[%c0_92, %c0_93] : memref<6x1xf32, #tpu.memory_space<vmem>>, vector<6x1xf32>
    %191 = arith.negf %190 : vector<6x1xf32>
    %192 = math.exp %191 : vector<6x1xf32>
    %cst_94 = arith.constant 1.000000e+00 : f32
    %193 = vector.broadcast %cst_94 : f32 to vector<6x1xf32>
    %194 = arith.addf %193, %192 : vector<6x1xf32>
    %195 = arith.divf %193, %194 : vector<6x1xf32>
    %cst_95 = arith.constant 1.000000e+01 : f32
    %196 = vector.broadcast %cst_95 : f32 to vector<6x1xf32>
    %197 = arith.mulf %195, %196 : vector<6x1xf32>
    %198 = vector.broadcast %183 : vector<1x32xf32> to vector<6x32xf32>
    %199 = arith.subf %198, %189 : vector<6x32xf32>
    %200 = vector.broadcast %197 : vector<6x1xf32> to vector<6x32xf32>
    %201 = arith.mulf %200, %199 : vector<6x32xf32>
    %c0_96 = arith.constant 0 : index
    %c0_97 = arith.constant 0 : index
    %202 = vector.load %arg19[%c0_96, %c0_97] : memref<6x32xf32, #tpu.memory_space<vmem>>, vector<6x32xf32>
    %203 = arith.mulf %201, %202 : vector<6x32xf32>
    %c0_98 = arith.constant 0 : index
    %c0_99 = arith.constant 0 : index
    %204 = vector.load %arg20[%c0_98, %c0_99] : memref<32x256xbf16, #tpu.memory_space<vmem>>, vector<32x256xbf16>
    %205 = arith.truncf %203 : vector<6x32xf32> to vector<6x32xbf16>
    %cst_100 = arith.constant dense<0.000000e+00> : vector<6x256xf32>
    %206 = tpu.matmul %205, %204, %cst_100 {dimension_numbers = #tpu.dot_dimension_numbers<[1], [0], [0], [1], [0, 0, 1, 1], [], []>} : vector<6x32xbf16>, vector<32x256xbf16>, vector<6x256xf32> -> vector<6x256xf32>
    %c0_101 = arith.constant 0 : index
    %c0_102 = arith.constant 0 : index
    %207 = vector.load %arg21[%c0_101, %c0_102] : memref<1x256xf32, #tpu.memory_space<vmem>>, vector<1x256xf32>
    %208 = vector.broadcast %207 : vector<1x256xf32> to vector<6x256xf32>
    %209 = arith.addf %206, %208 : vector<6x256xf32>
    %210 = math.tanh %209 : vector<6x256xf32>
    %c0_103 = arith.constant 0 : index
    %c0_104 = arith.constant 0 : index
    %211 = vector.load %arg22[%c0_103, %c0_104] : memref<256x128xbf16, #tpu.memory_space<vmem>>, vector<256x128xbf16>
    %212 = arith.truncf %210 : vector<6x256xf32> to vector<6x256xbf16>
    %cst_105 = arith.constant dense<0.000000e+00> : vector<6x128xf32>
    %213 = tpu.matmul %212, %211, %cst_105 {dimension_numbers = #tpu.dot_dimension_numbers<[1], [0], [0], [1], [0, 0, 1, 1], [], []>} : vector<6x256xbf16>, vector<256x128xbf16>, vector<6x128xf32> -> vector<6x128xf32>
    %c0_106 = arith.constant 0 : index
    %c0_107 = arith.constant 0 : index
    %214 = vector.load %arg23[%c0_106, %c0_107] : memref<1x128xf32, #tpu.memory_space<vmem>>, vector<1x128xf32>
    %215 = vector.broadcast %214 : vector<1x128xf32> to vector<6x128xf32>
    %216 = arith.addf %213, %215 : vector<6x128xf32>
    %217 = math.tanh %216 : vector<6x128xf32>
    %c0_108 = arith.constant 0 : index
    %c0_109 = arith.constant 0 : index
    %218 = vector.load %arg24[%c0_108, %c0_109] : memref<128x1xbf16, #tpu.memory_space<vmem>>, vector<128x1xbf16>
    %219 = arith.truncf %217 : vector<6x128xf32> to vector<6x128xbf16>
    %cst_110 = arith.constant dense<0.000000e+00> : vector<6x1xf32>
    %220 = tpu.matmul %219, %218, %cst_110 {dimension_numbers = #tpu.dot_dimension_numbers<[1], [0], [0], [1], [0, 0, 1, 1], [], []>} : vector<6x128xbf16>, vector<128x1xbf16>, vector<6x1xf32> -> vector<6x1xf32>
    %c0_111 = arith.constant 0 : index
    %c0_112 = arith.constant 0 : index
    %221 = vector.load %arg25[%c0_111, %c0_112] : memref<1x1xf32, #tpu.memory_space<vmem>>, vector<1x1xf32>
    %222 = vector.broadcast %221 : vector<1x1xf32> to vector<6x1xf32>
    %223 = arith.addf %220, %222 : vector<6x1xf32>
    %224 = arith.negf %223 : vector<6x1xf32>
    %225 = math.exp %224 : vector<6x1xf32>
    %cst_113 = arith.constant 1.000000e+00 : f32
    %226 = vector.broadcast %cst_113 : f32 to vector<6x1xf32>
    %227 = arith.addf %226, %225 : vector<6x1xf32>
    %228 = arith.divf %226, %227 : vector<6x1xf32>
    %c0_114 = arith.constant 0 : index
    %c0_115 = arith.constant 0 : index
    %229 = vector.load %arg26[%c0_114, %c0_115] : memref<6x1xf32, #tpu.memory_space<vmem>>, vector<6x1xf32>
    tpu.vector_store %arg26[%c0_114, %c0_115], %228 {strides = array<i32>} : memref<6x1xf32, #tpu.memory_space<vmem>>, vector<6x1xf32>,
    return
  }
}

</mosaic_0001>

<bundles_post_ra>
// kernel: dgcd_testforward.1
= control target key start
LH: loop header
LB: loop body
LE: loop exit
PB: predicated region body
PF: predicated region fallthrough
CT: control target
= control target key end

     0   :  { %v2288_v0 = vmov 0   ;;  %v2289_v5 = vmov 0.0   ;;  %v2290_v10 = vmov 0.0|0.0   ;;  %vm2291_vm0 = vmmov 0   ;;  %s2781_s2 = inlined_call_operand.vmem [shape: f32[12,1], index: 2, kind: input, shape index: {}]   ;;  %s2782_s1 = inlined_call_operand.vmem [shape: s32[12,1], index: 1, kind: input, shape index: {}]   ;;  %s2783_s4 = inlined_call_operand.vmem [shape: s32[12,1], index: 4, kind: input, shape index: {}]   ;;  %s2784_s5 = inlined_call_operand.vmem [shape: f32[12,1], index: 5, kind: input, shape index: {}]   ;;  %s2785_s0 = inlined_call_operand.vmem [shape: s32[1,12], index: 0, kind: input, shape index: {}]   ;;  %s2786_s3 = inlined_call_operand.vmem [shape: s32[1,12], index: 3, kind: input, shape index: {}]   ;;  %s2787_s8 = inlined_call_operand.vmem [shape: f32[8,32], index: 8, kind: input, shape index: {}]   ;;  %s2788_s9 = inlined_call_operand.vmem [shape: bf16[32,64], index: 9, kind: input, shape index: {}]   ;;  %s2789_s7 = inlined_call_operand.vmem [shape: f32[8,32], index: 7, kind: input, shape index: {}]   ;;  %s2790_s11 = inlined_call_operand.vmem [shape: bf16[32,64], index: 11, kind: input, shape index: {}]   ;;  %s2791_s6 = inlined_call_operand.vmem [shape: f32[1,32], index: 6, kind: input, shape index: {}]   ;;  %s2792_s10 = inlined_call_operand.vmem [shape: f32[1,64], index: 10, kind: input, shape index: {}]   ;;  %s2793_s12 = inlined_call_operand.vmem [shape: f32[1,64], index: 12, kind: input, shape index: {}]   ;;  %s2794_s13 = inlined_call_operand.vmem [shape: bf16[32,32], index: 13, kind: input, shape index: {}]   ;;  %s2795_s18 = inlined_call_operand.vmem [shape: f32[6,1], index: 18, kind: input, shape index: {}]   ;;  %s2796_s15 = inlined_call_operand.vmem [shape: bf16[64,32], index: 15, kind: input, shape index: {}]   ;;  %s2797_s14 = inlined_call_operand.vmem [shape: f32[1,32], index: 14, kind: input, shape index: {}]   ;;  %s2798_s20 = inlined_call_operand.vmem [shape: bf16[32,256], index: 20, kind: input, shape index: {}]   ;;  %s2799_s22 = inlined_call_operand.vmem [shape: bf16[256,128], index: 22, kind: input, shape index: {}]   ;;  %s2800_s17 = inlined_call_operand.vmem [shape: f32[6,32], index: 17, kind: input, shape index: {}]   ;;  %s2801_s16 = inlined_call_operand.vmem [shape: f32[1,32], index: 16, kind: input, shape index: {}]   ;;  %s2802_s19 = inlined_call_operand.vmem [shape: f32[6,32], index: 19, kind: input, shape index: {}]   ;;  %s2803_s24 = inlined_call_operand.vmem [shape: bf16[128,1], index: 24, kind: input, shape index: {}]   ;;  %s2804_s21 = inlined_call_operand.vmem [shape: f32[1,256], index: 21, kind: input, shape index: {}]   ;;  %s2805_s25 = inlined_call_operand.<no memory space> [shape: f32[1,1], index: 25, kind: input, shape index: {}]   ;;  %s2806_s23 = inlined_call_operand.vmem [shape: f32[1,128], index: 23, kind: input, shape index: {}]   ;;  %s2807_s26 = inlined_call_operand.vmem [shape: f32[6,1], index: 26, kind: output, shape index: {}]  }
   0x1   :  { %2814 = sst [smem:[#allocation3_spill]] %s2781_s2  ;;  %2195 = vset.pattern.permute.xlu1 %v2288_v0  ;;  %2194 = vset.pattern.permute.xlu0 %v2288_v0  ;;  %v2292_v11 = vmov 1.0   ;;  %v95_v12 = vlaneseq  ;;  %vm131_vm3 = vcmask 1043456   ;;  %vm2293_vm4 = vmmov 1  }
   0x2   :  { %2815 = sst [smem:[#allocation4_spill]] %s2782_s1  ;;  %2035 = vmatprep.subr.mxu1 %v2289_v5  ;;  %2168 = vmatprep.subr.bf16.mxu0 %v2290_v10  ;;  %vm2474_vm5 = vmpackc.low %vm131_vm3, %vm2293_vm4  ;;  %vm127_vm9 = vcmask 97280   ;;  %vm205_vm11 = vcmask 64512   ;;  %vm1246_vm4 = vcmask 1046528  }
   0x3   :  { %2816 = sst [smem:[#allocation5_spill]] %s2783_s4  ;;  %2032 = vmatprep.mubr.msk.f32.mxu0 %vm2291_vm0, %v2289_v5  ;;  %2037 = vmatprep.mubr.msk.f32.mxu1 %vm2291_vm0, %v2289_v5  ;;  %v104_v13 = vand.u32 127, %v95_v12  ;;  %v2467_v19 = vshrl.u32 %v95_v12, 7 }
   0x4   :  { %2817 = sst [smem:[#allocation6_spill]] %s2784_s5  ;;  %2036 = vmatpush3.msra.mxu1 %v2292_v11 }
   0x5   :  { %2818 = sst [smem:[#allocation7_spill]] %s2785_s0  ;;  %s2826_s0 = sld [smem:[#allocation4_spill]]  ;;  %2040 = vmatprep.subr.mxu1 %v2289_v5  ;;  %v2524_v63 = vsub.s32 0, %v2467_v19 }
   0x6   :  { %2819 = sst [smem:[#allocation8_spill]] %s2786_s3  ;;  %s2829_s2 = sld [smem:[#allocation7_spill]] }
   0x7   :  { %2820 = sst [smem:[#allocation9_spill]] %s2787_s8  ;;  %s2832_s3 = sld [smem:[#allocation8_spill]] }
   0x8   :  { %2821 = sst [smem:[#allocation10_spill]] %s2788_s9  ;;  %s2825_s9 = sld [smem:[#allocation3_spill]] }
   0x9   :  { %2822 = sst [smem:[#allocation11_spill]] %s2789_s7  ;;  %s2833_s8 = sld [smem:[#allocation9_spill]] }
   0xa   :  { %2823 = sst [smem:[#allocation12_spill]] %s2790_s11  ;;  %s2834_s5 = sld [smem:[#allocation10_spill]] }
   0xb   :  { %2824 = sst [smem:[#allocation13_spill]] %s2791_s6  ;;  %v91_v2 = vld [vmem:[%s2826_s0] sm:$0xff]  ;;  %v92_v4 = vld [vmem:[%s2826_s0 + $0x8] sm:$0xf]  ;;  %s2835_s7 = sld [smem:[#allocation11_spill]] }
   0xc   :  { %106 = vperm.xlu0 %2194, %v91_v2   ;;  %s2827_s6 = sld [smem:[#allocation5_spill]]  ;;  %v1878_v20 = vld [vmem:[%s2829_s2] ss:$0 sm:$0xff]  ;;  %s2836_s30 = sld [smem:[#allocation12_spill]] }
   0xd   :  { %vm101_vm6 = vcmp.eq.s32.totalorder %v2467_v19, %v1878_v20  ;;  %v1883_v29 = vld [vmem:[%s2832_s3] ss:$0 sm:$0xff]  ;;  %s2837_s1 = sld [smem:[#allocation13_spill]] }
   0xe   :  { %v93_v1 = vld [vmem:[%s2825_s9] sm:$0xff]  ;;  %v94_v3 = vld [vmem:[%s2825_s9 + $0x8] sm:$0xf]  ;;  %s2828_s9 = sld [smem:[#allocation6_spill]]  ;;  %v102_v28 = vsel %vm101_vm6, 1.0, %v2289_v5  ;;  %vm382_vm10 = vcmp.eq.s32.totalorder %v2467_v19, %v1883_v29 }
   0xf   :  { %117 = vperm.xlu1 %2195, %v93_v1   ;;  %v383_v37 = vsel %vm382_vm10, 1.0, %v2289_v5  ;;  %v88_v56 = vld [vmem:[%s2833_s8] sm:$0xff]  ;;  %s2297_s8 = smov 32  }
  0x10   :  { %109 = vperm.xlu0 %2194, %v92_v4   ;;  %v89_v57 = vpack.c.bf16 %v88_v56, %v88_v56  ;;  %v2196_v59 = vld [vmem:[%s2834_s5] sm:$0xff]  }
  0x12   :  { %v375_v6 = vld [vmem:[%s2827_s6 + $0x8] sm:$0xf]  ;;  %v374_v7 = vld [vmem:[%s2827_s6] sm:$0xff]  ;;  %v651_v58 = vsel %vm131_vm3, %v89_v57, 0  ;;  %vm992_vm3 = vcmask 253952  }
  0x13   :  { %122 = vperm.xlu1 %2195, %v94_v3   ;;  %v86_v26 = vld [vmem:[%s2837_s1] sm:$0x1] }
  0x14   :  { %385 = vperm.xlu0 %2194, %v374_v7   ;;  %v377_v8 = vld [vmem:[%s2828_s9 + $0x8] sm:$0xf]  ;;  %v376_v9 = vld [vmem:[%s2828_s9] sm:$0xff]  ;;  %s2295_s9 = smov 96  }
  0x17   :  { %388 = vperm.xlu1 %2195, %v375_v6  }
  0x18   :  { %396 = vperm.xlu0 %2194, %v376_v9  }
  0x1b   :  { %401 = vperm.xlu1 %2195, %v377_v8  }
  0x8b   :  { %v107_v15 = vpop.permute.xlu0 %106 }
  0x8c   :  { %vm111_vm1 = vcmp.eq.s32.totalorder %v104_v13, %v107_v15  ;;  %v2531_v15 = vld [vmem:[%s2835_s7] sm:$0xff] }
  0x8d   :  { %v113_v16 = vsel %vm111_vm1, 1.0, %v2289_v5  ;;  %vm718_vm1 = vcmask 261120  }
  0x8e   :  { %v118_v14 = vpop.permute.xlu1 %117 }
  0x8f   :  { %v110_v18 = vpop.permute.xlu0 %109  ;;  %v125_v22 = vmul.f32 %v118_v14, %v113_v16  ;;  %v2294_v16 = vmov 0.125  }
  0x90   :  { %vm112_vm2 = vcmp.eq.s32.totalorder %v104_v13, %v110_v18 }
  0x91   :  { %v114_v21 = vsel %vm112_vm2, 1.0, %v2289_v5  ;;  %vm839_vm2 = vcmask 1040384  }
  0x92   :  { %v123_v17 = vpop.permute.xlu1 %122 }
  0x93   :  { %v126_v23 = vmul.f32 %v123_v17, %v114_v21  ;;  %v386_v25 = vpop.permute.xlu0 %385  ;;  %v2197_v17 = vld [vmem:[%s2834_s5 + $0x8] sm:$0xff]  }
  0x94   :  { %vm390_vm8 = vcmp.eq.s32.totalorder %v104_v13, %v386_v25  ;;  %v2199_v25 = vld [vmem:[%s2836_s30 + $0x8] sm:$0xff]  }
  0x95   :  { %v2169_v27 = vpack.c.bf16 %v126_v23, %v125_v22  ;;  %v392_v32 = vsel %vm390_vm8, 1.0, %v2289_v5  ;;  %v2198_v22 = vld [vmem:[%s2836_s30] sm:$0xff]  }
  0x96   :  { %v389_v24 = vpop.permute.xlu1 %388 }
  0x97   :  { %vm391_vm7 = vcmp.eq.s32.totalorder %v104_v13, %v389_v24  ;;  %2171 = vmatpush3.bf16.msk.msra.mxu0 %vm2474_vm5, %v2169_v27  ;;  %v397_v33 = vpop.permute.xlu0 %396 }
  0x98   :  { %v393_v30 = vsel %vm391_vm7, 1.0, %v2289_v5  ;;  %2172 = vmatprep.subr.bf16.mxu0 %v2290_v10  ;;  %v404_v35 = vmul.f32 %v397_v33, %v392_v32 }
  0x9a   :  { %v402_v31 = vpop.permute.xlu1 %401  ;;  %2033 = vmatmul.mubr.msk.f32.vlgmr.msra.gmra.mrb[0].mxu0 %vm127_vm9, %v102_v28 }
  0x9b   :  { %v405_v34 = vmul.f32 %v402_v31, %v393_v30  ;;  %2049 = vmatprep.mubr.msk.f32.mxu0 %vm2291_vm0, %v2289_v5 }
  0x9d   :  { %v2173_v36 = vpack.c.bf16 %v405_v34, %v404_v35  ;;  %v1889_v34 = vld [vmem:[%s2792_s10] ss:$0 sm:$0xff] }
  0x9f   :  { %2175 = vmatpush3.bf16.msk.msra.mxu0 %vm2474_vm5, %v2173_v36  ;;  %vm1415_vm5 = vcmask 523264  }
  0xa0   :  { %2057 = vmatprep.subr.mxu0 %v2289_v5 }
  0xa2   :  { %2050 = vmatmul.mubr.msk.f32.vlgmr.msra.gmra.mrb[2].mxu0 %vm127_vm9, %v383_v37 }
  0xa3   :  { %2059 = vmatprep.mubr.msk.f32.mxu0 %vm2291_vm0, %v2289_v5 }
 0x16d   :  { %v201_v38 = vpop.f32.mrb[0].mxu0 }
 0x16e   :  { %v2034_v39 = vpop.f32.mrb[1].mxu0  ;;  %2038 = vmatmul.mubr.msk.f32.vlgmr.msra.gmra.mrb[0].mxu1 %vm205_vm11, %v201_v38 }
 0x16f   :  { %2041 = vmatpush3.msra.mxu1 %v201_v38  ;;  %2042 = vmatprep.mubr.msk.f32.mxu1 %vm2291_vm0, %v2289_v5  ;;  %v1894_v39 = vld [vmem:[%s2793_s12] ss:$0 sm:$0xff] }
 0x170   :  { %2052 = vmatprep.subr.mxu1 %v2289_v5 }
 0x172   :  { %2043 = vmatmul.mubr.msk.f32.vlgmr.msra.gmra.mrb[2].mxu1 %vm205_vm11, %v2292_v11 }
 0x173   :  { %2053 = vmatpush3.msra.mxu1 %v2292_v11  ;;  %2054 = vmatprep.mubr.msk.f32.mxu1 %vm2291_vm0, %v2289_v5 }
 0x174   :  { %2062 = vmatprep.subr.bf16.mxu1 %v2289_v5 }
 0x175   :  { %v478_v40 = vpop.f32.mrb[2].mxu0 }
 0x176   :  { %v2051_v41 = vpop.f32.mrb[3].mxu0  ;;  %2058 = vmatpush3.msra.mxu0 %v478_v40  ;;  %2055 = vmatmul.mubr.msk.f32.vlgmr.msra.gmra.mrb[4].mxu1 %vm205_vm11, %v478_v40 }
 0x177   :  { %2060 = vmatmul.mubr.msk.f32.vlgmr.msra.gmra.mrb[4].mxu0 %vm205_vm11, %v2292_v11  ;;  %2068 = vmatprep.subr.bf16.mxu0 %v2289_v5 }
 0x178   :  { %2072 = vmatprep.mubr.msk.bf16.mxu0 %vm2291_vm0, %v2289_v5  ;;  %2064 = vmatprep.mubr.msk.bf16.mxu1 %vm2291_vm0, %v2289_v5 }
 0x179   :  { %2063 = vmatpush3.bf16.msra.mxu1 %v651_v58  ;;  %2069 = vmatpush3.bf16.msra.mxu0 %v2196_v59 }
 0x17a   :  { %2076 = vmatprep.subr.mxu1 %v2289_v5  ;;  %2070 = vmatprep.subr.bf16.mxu0 %v2289_v5 }
 0x17d   :  { %2071 = vmatpush3.bf16.msra.mxu0 %v2197_v17 }
 0x17e   :  { %2081 = vmatprep.subr.bf16.mxu0 %v2289_v5 }
 0x241   :  { %v275_v42 = vpop.f32.mrb[0].mxu1 }
 0x242   :  { %vm352_vm12 = vcmp.gt.f32.partialorder %v275_v42, 0.0  ;;  %v2039_v43 = vpop.f32.mrb[1].mxu1 }
 0x243   :  { %v353_v44 = vsel %vm352_vm12, %v275_v42, 1.0 }
 0x244   :  { %2236 = vrcp.f32 %v353_v44 }
 0x245   :  { %v348_v45 = vpop.f32.mrb[2].mxu1 }
 0x246   :  { %v2044_v46 = vpop.f32.mrb[3].mxu1  ;;  %vm357_vm14 = vcmp.gt.f32.partialorder %v348_v45, 0.0 }
 0x247   :  { %v358_v60 = vsel %vm357_vm14, %v348_v45, 1.0 }
 0x249   :  { %v551_v48 = vpop.f32.mrb[4].mxu1 }
 0x24a   :  { %v621_v47 = vpop.f32.mrb[4].mxu0  ;;  %vm625_vm13 = vcmp.gt.f32.partialorder %v551_v48, 0.0  ;;  %v2056_v50 = vpop.f32.mrb[5].mxu1 }
 0x24b   :  { %v2061_v49 = vpop.f32.mrb[5].mxu0  ;;  %v626_v51 = vsel %vm625_vm13, %v551_v48, 1.0  ;;  %vm630_vm15 = vcmp.gt.f32.partialorder %v621_v47, 0.0  ;;  %v2296_v50 = vmov 1.0|1.0  }
 0x24c   :  { %2238 = vrcp.f32 %v626_v51  ;;  %v631_v61 = vsel %vm630_vm15, %v621_v47, 1.0 }
 0x24d   :  { %2240 = vrcp.f32 %v358_v60 }
 0x24e   :  { %v2237_v52 = vpop.eup %2236  ;;  %2242 = vrcp.f32 %v631_v61 }
 0x24f   :  { %v356_v53 = vsel %vm352_vm12, %v2237_v52, 0.0 }
 0x250   :  { %364 = vperm.xlu0 %2194, %v356_v53  }
 0x256   :  { %v2239_v54 = vpop.eup %2238 }
 0x257   :  { %v629_v55 = vsel %vm625_vm13, %v2239_v54, 0.0  ;;  %v2241_v62 = vpop.eup %2240 }
 0x258   :  { %637 = vperm.xlu1 %2195, %v629_v55   ;;  %v361_v1 = vsel %vm357_vm14, %v2241_v62, 0.0  ;;  %v2243_v6 = vpop.eup %2242 }
 0x259   :  { %v371_v3 = vrot.slane %v361_v1, %v2524_v63  ;;  %v634_v8 = vsel %vm630_vm15, %v2243_v6, 0.0 }
 0x25a   :  { %v644_v11 = vrot.slane %v634_v8, %v2524_v63  ;;  %v2200_v8 = vld [vmem:[%s2794_s13] sm:$0xff]  }
 0x2cf   :  { %v365_v2 = vpop.permute.xlu0 %364 }
 0x2d0   :  { %v367_v4 = vmul.f32 %v365_v2, %v201_v38 }
 0x2d2   :  { %v372_v7 = vmul.f32 %v371_v3, %v367_v4 }
 0x2d7   :  { %v638_v9 = vpop.permute.xlu1 %637 }
 0x2d8   :  { %v640_v12 = vmul.f32 %v638_v9, %v478_v40  ;;  %v2201_v9 = vld [vmem:[%s2794_s13 + $0x8] sm:$0xff]  }
 0x2da   :  { %v645_v13 = vmul.f32 %v644_v11, %v640_v12  ;;  %v913_v11 = vpack.c.bf16 %v2531_v15, %v2531_v15 }
 0x2dc   :  { %v646_v14 = vpack.c.bf16 %v645_v13, %v372_v7 }
 0x2de   :  { %2065 = vmatmul.mubr.msk.bf16.vlgmr.msra.gmra.mrb[8].mxu1 %vm205_vm11, %v646_v14 }
 0x2df   :  { %2077 = vmatpush3.msra.mxu1 %v2531_v15  ;;  %2078 = vmatprep.mubr.msk.f32.mxu1 %vm2291_vm0, %v2289_v5 }
 0x2e0   :  { %2089 = vmatprep.subr.bf16.mxu1 %v2289_v5 }
 0x2e6   :  { %2079 = vmatmul.mubr.msk.f32.vlgmr.msra.gmra.mrb[6].mxu1 %vm205_vm11, %v2294_v16 }
 0x2e7   :  { %2093 = vmatprep.mubr.msk.bf16.mxu1 %vm2291_vm0, %v2289_v5  ;;  %2090 = vmatpush3.bf16.msra.mxu1 %v2200_v8 }
 0x2e8   :  { %2091 = vmatprep.subr.bf16.mxu1 %v2289_v5 }
 0x2eb   :  { %2092 = vmatpush3.bf16.msra.mxu1 %v2201_v9 }
 0x2ec   :  { %2180 = vmatprep.subr.bf16.mxu1 %v2290_v10 }
 0x2ee   :  { %2094 = vmatmul.mubr.msk.bf16.vlgmr.msra.gmra.mrb[12].mxu1 %vm718_vm1, %v913_v11 }
 0x2ef   :  { %2181 = vmatpush3.bf16.msra.mxu1 %v2296_v50  ;;  %2122 = vmatprep.mubr.msk.f32.mxu1 %vm2291_vm0, %v2289_v5 }
 0x2f0   :  { %2182 = vmatprep.subr.bf16.mxu1 %v2290_v10 }
 0x2f3   :  { %2183 = vmatpush3.bf16.msra.mxu1 %v2296_v50 }
 0x2f4   :  { %2136 = vmatprep.subr.bf16.mxu1 %v2289_v5 }
 0x3b1   :  { %v687_v18 = vpop.f32.mrb[8].mxu1 }
 0x3b2   :  { %v2066_v20 = vpop.f32.mrb[9].mxu1 }
 0x3b3   :  { %v690_v21 = vpop.f32.mrb[10].mxu1 }
 0x3b4   :  { %v698_v23 = vpack.c.bf16 %v690_v21, %v687_v18  ;;  %v2067_v24 = vpop.f32.mrb[11].mxu1 }
 0x3b6   :  { %2073 = vmatmul.mubr.msk.bf16.vlgmr.msra.gmra.mrb[8].mxu0 %vm718_vm1, %v698_v23 }
 0x3b7   :  { %2082 = vmatpush3.bf16.msra.mxu0 %v2198_v22  ;;  %2085 = vmatprep.mubr.msk.bf16.mxu0 %vm2291_vm0, %v2289_v5 }
 0x3b8   :  { %2083 = vmatprep.subr.bf16.mxu0 %v2289_v5 }
 0x3b9   :  { %v832_v27 = vpop.f32.mrb[6].mxu1 }
 0x3ba   :  { %v837_v28 = vrot.slane %v832_v27, 7  ;;  %v2080_v29 = vpop.f32.mrb[7].mxu1 }
 0x3bb   :  { %2084 = vmatpush3.bf16.msra.mxu0 %v2199_v25 }
 0x3bc   :  { %v840_v30 = vsel %vm839_vm2, %v86_v26, %v837_v28  ;;  %2176 = vmatprep.subr.bf16.mxu0 %v2290_v10 }
 0x3bd   :  { %v845_v31 = vpack.c.bf16 %v840_v30, %v840_v30 }
 0x3bf   :  { %2086 = vmatmul.mubr.msk.bf16.vlgmr.msra.gmra.mrb[12].mxu0 %vm718_vm1, %v845_v31 }
 0x3c0   :  { %2105 = vmatprep.mubr.msk.f32.mxu0 %vm2291_vm0, %v2289_v5  ;;  %2177 = vmatpush3.bf16.msra.mxu0 %v2296_v50 }
 0x3c1   :  { %2178 = vmatprep.subr.bf16.mxu0 %v2290_v10  ;;  %v2616_v26 = vpop.f32.mrb[12].mxu1 }
 0x3c2   :  { %v2095_v27 = vpop.f32.mrb[13].mxu1 }
 0x3c3   :  { %v973_v28 = vpop.f32.mrb[14].mxu1 }
 0x3c4   :  { %2179 = vmatpush3.bf16.msra.mxu0 %v2296_v50  ;;  %v2096_v30 = vpop.f32.mrb[15].mxu1 }
 0x3c5   :  { %2131 = vmatprep.subr.mxu0 %v2289_v5 }
 0x489   :  { %v756_v32 = vpop.f32.mrb[8].mxu0 }
 0x48a   :  { %v2074_v33 = vpop.f32.mrb[9].mxu0  ;;  %v2574_v40 = vadd.f32 %v1889_v34, %v756_v32 }
 0x48b   :  { %v759_v35 = vpop.f32.mrb[10].mxu0 }
 0x48c   :  { %v2567_v36 = vadd.f32 %v1889_v34, %v759_v35  ;;  %v2075_v37 = vpop.f32.mrb[11].mxu0  ;;  %v977_v45 = vrot.slane %v2574_v40, 7 }
 0x48e   :  { %v980_v38 = vrot.slane %v2567_v36, 7 }
 0x490   :  { %981 = vrot.lane.b32.xlu0 %v980_v38, %s2295_s9 }
 0x492   :  { %v902_v41 = vpop.f32.mrb[12].mxu0 }
 0x493   :  { %v2576_v42 = vadd.f32 %v1894_v39, %v902_v41  ;;  %v2087_v43 = vpop.f32.mrb[13].mxu0 }
 0x494   :  { %v905_v44 = vpop.f32.mrb[14].mxu0 }
 0x495   :  { %v2580_v46 = vmul.f32 0.125, %v2576_v42  ;;  %v2088_v47 = vpop.f32.mrb[15].mxu0 }
 0x497   :  { %v984_v48 = vsel %vm839_vm2, %v2580_v46, %v977_v45 }
 0x498   :  { %v986_v49 = vsel %vm718_vm1, %v984_v48, -inf }
 0x499   :  { %987 = vmax.xlane.f32.xlu1 %v986_v49 }
 0x502   :  { %v982_v51 = vpop.permute.xlu0 %981 }
 0x503   :  { %v985_v52 = vsel %vm839_vm2, %v977_v45, %v982_v51  ;;  %v993_v54 = vsel %vm992_vm3, %v982_v51, -inf }
 0x504   :  { %v989_v53 = vsel %vm718_vm1, %v985_v52, -inf }
 0x505   :  { %990 = vmax.xlane.f32.xlu0 %v989_v53 }
 0x509   :  { %994 = vmax.xlane.f32.xlu0 %v993_v54 }
 0x526   :  { %v988_v55 = vpop.xlane.xlu1 %987 }
 0x527   :  { %v996_v56 = vsub.f32 %v984_v48, %v988_v55 }
 0x529   :  { %v999_v57 = vmul.f32 1.442695, %v996_v56  ;;  %v1472_v56 = vld [vmem:[%s2795_s18] sm:$0x3f] }
 0x52b   :  { %2244 = vpow2.f32 %v999_v57 }
 0x535   :  { %v2245_v58 = vpop.eup %2244 }
 0x536   :  { %2106 = vmatmul.mubr.msk.f32.vlgmr.msra.gmra.mrb[6].mxu0 %vm718_vm1, %v2245_v58 }
 0x537   :  { %2108 = vmatprep.mubr.msk.f32.mxu0 %vm2291_vm0, %v2289_v5 }
 0x592   :  { %v991_v59 = vpop.xlane.xlu0 %990 }
 0x593   :  { %v997_v60 = vsub.f32 %v985_v52, %v991_v59  ;;  %v1916_v59 = vmul.f32 -1.442695, %v1472_v56 }
 0x595   :  { %v1001_v61 = vmul.f32 1.442695, %v997_v60 }
 0x596   :  { %v995_v62 = vpop.xlane.xlu0 %994 }
 0x597   :  { %2246 = vpow2.f32 %v1001_v61  ;;  %v998_v1 = vsub.f32 %v982_v51, %v995_v62 }
 0x599   :  { %v1003_v2 = vmul.f32 1.442695, %v998_v1 }
 0x59b   :  { %2248 = vpow2.f32 %v1003_v2 }
 0x5a1   :  { %v2247_v3 = vpop.eup %2246 }
 0x5a2   :  { %2109 = vmatmul.mubr.msk.f32.gmra.mrb[16].mxu0 %vm718_vm1, %v2247_v3 }
 0x5a3   :  { %2111 = vmatprep.mubr.msk.f32.mxu0 %vm2291_vm0, %v2289_v5 }
 0x5a5   :  { %v2249_v4 = vpop.eup %2248 }
 0x5a6   :  { %2112 = vmatmul.mubr.msk.f32.gmra.mrb[18].mxu0 %vm718_vm1, %v2249_v4 }
 0x5a7   :  { %2133 = vmatprep.mubr.msk.f32.mxu0 %vm2291_vm0, %v2289_v5 }
 0x609   :  { %v1080_v6 = vpop.f32.mrb[6].mxu0 }
 0x60a   :  { %1096 = vperm.xlu1 %2195, %v1080_v6   ;;  %v2107_v7 = vpop.f32.mrb[7].mxu0 }
 0x675   :  { %v1085_v12 = vpop.f32.mrb[16].mxu0 }
 0x676   :  { %1101 = vperm.xlu0 %2194, %v1085_v12   ;;  %v2110_v13 = vpop.f32.mrb[17].mxu0 }
 0x679   :  { %v1090_v14 = vpop.f32.mrb[18].mxu0 }
 0x67a   :  { %1106 = vperm.xlu1 %2195, %v1090_v14   ;;  %v2113_v15 = vpop.f32.mrb[19].mxu0 }
 0x689   :  { %v1097_v17 = vpop.permute.xlu1 %1096 }
 0x68a   :  { %2250 = vrcp.f32 %v1097_v17 }
 0x694   :  { %v2251_v18 = vpop.eup %2250 }
 0x695   :  { %v1110_v20 = vmul.f32 %v2251_v18, %v2245_v58 }
 0x697   :  { %v1115_v21 = vadd.f32 1e-10, %v1110_v20 }
 0x699   :  { %2252 = vlog2.f32 %v1115_v21  ;;  %v1300_v21 = vrot.slane %v2576_v42, 7 }
 0x6a3   :  { %v2253_v22 = vpop.eup %2252 }
 0x6a4   :  { %v1119_v23 = vmul.f32 0.6931472, %v2253_v22 }
 0x6a6   :  { %v1125_v24 = vmul.f32 1.442695, %v1119_v23 }
 0x6a8   :  { %v1128_v25 = vmul.f32 %v1125_v24, %v1110_v20 }
 0x6aa   :  { %2123 = vmatmul.mubr.msk.f32.vlgmr.msra.gmra.mrb[16].mxu1 %vm718_vm1, %v1128_v25 }
 0x6ab   :  { %2125 = vmatprep.mubr.msk.f32.mxu1 %vm2291_vm0, %v2289_v5 }
 0x6f5   :  { %v1102_v10 = vpop.permute.xlu0 %1101 }
 0x6f6   :  { %2254 = vrcp.f32 %v1102_v10 }
 0x6f9   :  { %v1107_v29 = vpop.permute.xlu1 %1106 }
 0x6fa   :  { %2256 = vrcp.f32 %v1107_v29 }
 0x700   :  { %v2255_v31 = vpop.eup %2254 }
 0x701   :  { %v1112_v32 = vmul.f32 %v2255_v31, %v2247_v3 }
 0x703   :  { %v1116_v33 = vadd.f32 1e-10, %v1112_v32 }
 0x704   :  { %v2257_v34 = vpop.eup %2256 }
 0x705   :  { %2258 = vlog2.f32 %v1116_v33  ;;  %v1114_v35 = vmul.f32 %v2257_v34, %v2249_v4 }
 0x707   :  { %v1117_v37 = vadd.f32 1e-10, %v1114_v35 }
 0x709   :  { %2260 = vlog2.f32 %v1117_v37  ;;  %v2203_v37 = vld [vmem:[%s2796_s15 + $0x8] sm:$0xff]  }
 0x70a   :  { %2262 = vpow2.f32 %v1916_v59 }
 0x70f   :  { %v2259_v38 = vpop.eup %2258 }
 0x710   :  { %v1121_v39 = vmul.f32 0.6931472, %v2259_v38 }
 0x712   :  { %v1126_v41 = vmul.f32 1.442695, %v1121_v39 }
 0x713   :  { %v2261_v43 = vpop.eup %2260 }
 0x714   :  { %v1129_v44 = vmul.f32 %v1126_v41, %v1112_v32  ;;  %v1123_v45 = vmul.f32 0.6931472, %v2261_v43  ;;  %v2263_v7 = vpop.eup %2262  ;;  %v2202_v32 = vld [vmem:[%s2796_s15] sm:$0xff]   ;;  %v2204_v43 = vld [vmem:[%s2796_s15 + $0x10] sm:$0xff]  }
 0x715   :  { %v1476_v13 = vadd.f32 1.0, %v2263_v7  ;;  %2137 = vmatpush3.bf16.msra.mxu1 %v2202_v32  ;;  %v2217_v7 = vld [vmem:[%s2799_s22 + $0x10] sm:$0xff]  }
 0x716   :  { %2126 = vmatmul.mubr.msk.f32.gmra.mrb[18].mxu1 %vm718_vm1, %v1129_v44  ;;  %v1127_v47 = vmul.f32 1.442695, %v1123_v45  ;;  %2138 = vmatprep.subr.bf16.mxu1 %v2289_v5 }
 0x717   :  { %2128 = vmatprep.mubr.msk.f32.mxu1 %vm2291_vm0, %v2289_v5 }
 0x718   :  { %v1130_v48 = vmul.f32 %v1127_v47, %v1114_v35  ;;  %v1277_v35 = vrot.slane %v2580_v46, %v2524_v63 }
 0x719   :  { %2139 = vmatpush3.bf16.msra.mxu1 %v2203_v37  ;;  %v2221_v37 = vld [vmem:[%s2799_s22 + $0x20] sm:$0xff]  }
 0x71a   :  { %2129 = vmatmul.mubr.msk.f32.gmra.mrb[20].mxu1 %vm718_vm1, %v1130_v48  ;;  %2140 = vmatprep.subr.bf16.mxu1 %v2289_v5 }
 0x71b   :  { %2144 = vmatprep.mubr.msk.bf16.mxu1 %vm2291_vm0, %v2289_v5 }
 0x71d   :  { %2141 = vmatpush3.bf16.msra.mxu1 %v2204_v43  ;;  %v2226_v43 = vld [vmem:[%s2799_s22 + $0x78] sm:$0xff]  }
 0x71e   :  { %2142 = vmatprep.subr.bf16.mxu1 %v2289_v5 }
 0x77d   :  { %v1206_v49 = vpop.f32.mrb[16].mxu1 }
 0x77e   :  { %v2124_v50 = vpop.f32.mrb[17].mxu1  ;;  %v1220_v51 = vsub.f32 0.0, %v1206_v49 }
 0x780   :  { %v1223_v53 = vmul.f32 0.17677669, %v1220_v51 }
 0x782   :  { %v1231_v60 = vrot.slane %v1223_v53, %v2524_v63 }
 0x7e9   :  { %v1211_v52 = vpop.f32.mrb[18].mxu1 }
 0x7ea   :  { %v1221_v54 = vsub.f32 0.0, %v1211_v52  ;;  %v2127_v55 = vpop.f32.mrb[19].mxu1 }
 0x7ec   :  { %v1224_v57 = vmul.f32 0.17677669, %v1221_v54 }
 0x7ed   :  { %v1216_v58 = vpop.f32.mrb[20].mxu1 }
 0x7ee   :  { %v1226_v61 = vadd.f32 %v1224_v57, %v1223_v53  ;;  %v1222_v62 = vsub.f32 0.0, %v1216_v58  ;;  %v2130_v1 = vpop.f32.mrb[21].mxu1 }
 0x7ef   :  { %v2212_v1 = vld [vmem:[%s2799_s22 + $0x40] sm:$0xff]  }
 0x7f0   :  { %v1232_v2 = vadd.f32 %v1231_v60, %v1226_v61  ;;  %v1225_v3 = vmul.f32 0.17677669, %v1222_v62  ;;  %v2206_v61 = vld [vmem:[%s2798_s20] ss:$8 sps:$4 sm:$0xff]   ;;  %v2209_v62 = vld [vmem:[%s2798_s20 + $0x10] ss:$8 sps:$4 sm:$0xff]  }
 0x7f2   :  { %2264 = vrcp.f32 %v1232_v2  ;;  %v1227_v4 = vadd.f32 %v1225_v3, %v1224_v57  ;;  %v2213_v2 = vld [vmem:[%s2799_s22] sm:$0xff]  }
 0x7f4   :  { %v1233_v6 = vadd.f32 %v1231_v60, %v1227_v4  ;;  %v2215_v4 = vld [vmem:[%s2799_s22 + $0x8] sm:$0xff]  }
 0x7f6   :  { %2266 = vrcp.f32 %v1233_v6  ;;  %v2216_v6 = vld [vmem:[%s2799_s22 + $0x50] sm:$0xff]  }
 0x7f7   :  { %2268 = vrcp.f32 %v1476_v13  ;;  %v1390_v13 = vld [vmem:[%s2801_s16] sm:$0x1] }
 0x7fc   :  { %v2265_v8 = vpop.eup %2264 }
 0x7fd   :  { %v1252_v9 = vmul.f32 %v2265_v8, %v1224_v57  ;;  %v1235_v11 = vmul.f32 %v2265_v8, %v1223_v53  ;;  %v1272_v12 = vmul.f32 %v2265_v8, %v1231_v60  ;;  %v1898_v53 = vld [vmem:[%s2797_s14] ss:$0 sm:$0xff]  ;;  %v2218_v8 = vld [vmem:[%s2799_s22 + $0x58] sm:$0xff]  }
 0x7fe   :  { %v971_v55 = vadd.f32 %v1898_v53, %v2616_v26 }
 0x7ff   :  { %1256 = vperm.xlu1 %2195, %v1252_v9   ;;  %v2219_v9 = vld [vmem:[%s2799_s22 + $0x18] sm:$0xff]  }
 0x800   :  { %v2267_v14 = vpop.eup %2266 }
 0x801   :  { %v1253_v15 = vmul.f32 %v2267_v14, %v1225_v3  ;;  %v1237_v17 = vmul.f32 %v2267_v14, %v1224_v57  ;;  %v1273_v18 = vmul.f32 %v2267_v14, %v1231_v60  ;;  %v2269_v20 = vpop.eup %2268  ;;  %v2214_v3 = vld [vmem:[%s2799_s22 + $0x48] sm:$0xff]  }
 0x802   :  { %v1479_v22 = vmul.f32 10.0, %v2269_v20 }
 0x803   :  { %1240 = vperm.xlu1 %2195, %v1235_v11   ;;  %1260 = vperm.xlu0 %2194, %v1253_v15   ;;  %v1465_v11 = vld [vmem:[%s2800_s17] sm:$0x3f] }
 0x807   :  { %1280 = vperm.xlu1 %2195, %v1272_v12   ;;  %1244 = vperm.xlu0 %2194, %v1237_v17   ;;  %v1915_v12 = vmul.f32 -1.442695, %v1465_v11 }
 0x809   :  { %2270 = vpow2.f32 %v1915_v12 }
 0x80b   :  { %1285 = vperm.xlu0 %2194, %v1273_v18  }
 0x80f   :  { %1301 = vrot.lane.b32.xlu0 %v1300_v21, %s2295_s9 }
 0x813   :  { %1487 = vperm.xlu0 %2194, %v1479_v22   ;;  %v2271_v22 = vpop.eup %2270 }
 0x87e   :  { %v1257_v23 = vpop.permute.xlu1 %1256 }
 0x87f   :  { %v1262_v10 = vrot.slane %v1257_v23, 1  ;;  %v1469_v23 = vadd.f32 1.0, %v2271_v22 }
 0x882   :  { %v1261_v24 = vpop.permute.xlu0 %1260  ;;  %v1241_v25 = vpop.permute.xlu1 %1240 }
 0x883   :  { %v1263_v27 = vrot.slane %v1261_v24, 1  ;;  %v1247_v33 = vrot.slane %v1241_v25, 1 }
 0x885   :  { %v1264_v28 = vsel %vm1246_vm4, %v1262_v10, %v1263_v27 }
 0x886   :  { %v1245_v29 = vpop.permute.xlu0 %1244  ;;  %v1281_v30 = vpop.permute.xlu1 %1280  ;;  %v1266_v31 = vmul.f32 %v1264_v28, %v2567_v36 }
 0x887   :  { %v1248_v34 = vrot.slane %v1245_v29, 1  ;;  %v1288_v38 = vmul.f32 %v1281_v30, %v1277_v35 }
 0x888   :  { %1268 = vrot.lane.b32.xlu1 %v1266_v31, %s2295_s9  ;;  %v1491_v31 = vld [vmem:[%s2802_s19] sm:$0x3f] }
 0x889   :  { %v1249_v39 = vsel %vm1246_vm4, %v1247_v33, %v1248_v34  ;;  %v1292_v46 = vrot.slane %v1288_v38, 1  ;;  %v2222_v38 = vld [vmem:[%s2799_s22 + $0x68] sm:$0xff]  }
 0x88a   :  { %v1286_v36 = vpop.permute.xlu0 %1285  ;;  %v1251_v50 = vmul.f32 %v1249_v39, %v2574_v40  ;;  %v2205_v40 = vld [vmem:[%s2796_s15 + $0x18] sm:$0xff]   ;;  %v2223_v39 = vld [vmem:[%s2799_s22 + $0x28] sm:$0xff]  }
 0x88b   :  { %v1289_v41 = vmul.f32 %v1286_v36, %v1277_v35  ;;  %2143 = vmatpush3.bf16.msra.mxu1 %v2205_v40  ;;  %v2220_v35 = vld [vmem:[%s2799_s22 + $0x60] sm:$0xff]   ;;  %v2224_v36 = vld [vmem:[%s2799_s22 + $0x70] sm:$0xff]  }
 0x88c   :  { %1997 = vmatprep.subr.bf16.mxu1 %v2212_v1 }
 0x88d   :  { %v1293_v44 = vrot.slane %v1289_v41, 1  ;;  %v2225_v41 = vld [vmem:[%s2799_s22 + $0x30] sm:$0xff]  }
 0x88e   :  { %v1302_v45 = vpop.permute.xlu0 %1301 }
 0x88f   :  { %v1304_v47 = vadd.f32 %v1302_v45, %v2576_v42  ;;  %v1294_v48 = vsel %vm1246_vm4, %v1292_v46, %v1293_v44  ;;  %v2227_v46 = vld [vmem:[%s2799_s22 + $0x38] sm:$0xff]   ;;  %v2228_v44 = vld [vmem:[%s2803_s24] sm:$0xff]   ;;  %v2229_v45 = vld [vmem:[%s2803_s24 + $0x8] sm:$0xff]  }
 0x891   :  { %v1376_v49 = vrot.slane %v1304_v47, 1  ;;  %v2230_v47 = vld [vmem:[%s2803_s24 + $0x10] sm:$0xff]  }
 0x892   :  { %v1488_v30 = vpop.permute.xlu0 %1487 }
 0x893   :  { %1377 = vrot.lane.b32.xlu1 %v1376_v49, %s2297_s8  ;;  %v1506_v49 = vsub.s32 1, %v2467_v19  ;;  %v2231_v19 = vld [vmem:[%s2803_s24 + $0x18] sm:$0xff]  }
 0x8fa   :  { %v1269_v51 = vpop.permute.xlu1 %1268 }
 0x8fb   :  { %v1271_v52 = vadd.f32 %v1269_v51, %v1251_v50 }
 0x8fd   :  { %v1296_v54 = vadd.f32 %v1294_v48, %v1271_v52  ;;  %v1498_v48 = vld [vmem:[%s2804_s21] sm:$0x3] }
 0x8fe   :  { %v1503_v50 = vrot.slane %v1498_v48, %v2524_v63  ;;  %v1507_v51 = vrot.slane %v1498_v48, %v1506_v49 }
 0x8ff   :  { %v1297_v42 = vmul.f32 0.33333334, %v1296_v54 }
 0x901   :  { %v1298_v56 = vadd.f32 %v1297_v42, %v971_v55 }
 0x903   :  { %2132 = vmatpush3.msra.mxu0 %v1298_v56 }
 0x904   :  { %2134 = vmatmul.mubr.msk.f32.vlgmr.msra.gmra.mrb[20].mxu0 %vm205_vm11, %v2294_v16  ;;  %v2211_v16 = vld [vmem:[%s2798_s20 + $0x14] ss:$8 sps:$4 sm:$0xff]  }
 0x905   :  { %1565 = vmatprep.mubr.bf16.mxu0 %v2288_v0  ;;  %v1378_v57 = vpop.permute.xlu1 %1377  ;;  %v2208_v0 = vld [vmem:[%s2798_s20 + $0x4] ss:$8 sps:$4 sm:$0xff]  }
 0x906   :  { %1533 = vmatprep.subr.bf16.mxu0 %v2208_v0  ;;  %v31_v0 = vstv %s2805_s25 }
 0x907   :  { %1534 = vmatpush1.bf16.msra.mxu0 %v2206_v61  ;;  %v2235_v61 = vld [vmem:[%s2803_s24 + $0x38] sm:$0xff]   ;;  %32 = vst [vmem:[#allocation2] sm:$0x1] %v31_v0 }
 0x908   :  { %1535 = vmatprep.subr.bf16.mxu0 %v2211_v16 }
 0x90b   :  { %1536 = vmatpush1.bf16.msra.mxu0 %v2209_v62  ;;  %v1922_v62 = vld [vmem:[%s2806_s23] ss:$0 sm:$0xff] }
 0x90c   :  { %2148 = vmatprep.subr.bf16.mxu0 %v2289_v5 }
 0x9d7   :  { %v1371_v58 = vpop.f32.mrb[20].mxu0 }
 0x9d8   :  { %v1380_v59 = vsel %vm718_vm1, %v1371_v58, %v1378_v57  ;;  %v2135_v60 = vpop.f32.mrb[21].mxu0 }
 0x9d9   :  { %v1389_v26 = vpack.c.bf16 %v1380_v59, %v1380_v59  ;;  %v2233_v60 = vld [vmem:[%s2803_s24 + $0x28] sm:$0xff]  }
 0x9db   :  { %2145 = vmatmul.mubr.msk.bf16.vlgmr.msra.gmra.mrb[24].mxu1 %vm1415_vm5, %v1389_v26  ;;  %v2234_v26 = vld [vmem:[%s2803_s24 + $0x30] sm:$0xff]  }
 0x9dc   :  { %1998 = vmatpush3.bf16.msra.mxu1 %v2213_v2 }
 0x9dd   :  { %1999 = vmatprep.subr.bf16.mxu1 %v2214_v3 }
 0x9e0   :  { %2000 = vmatpush3.bf16.msra.mxu1 %v2215_v4 }
 0x9e1   :  { %2001 = vmatprep.subr.bf16.mxu1 %v2216_v6 }
 0x9e4   :  { %2002 = vmatpush3.bf16.msra.mxu1 %v2217_v7 }
 0x9e5   :  { %2003 = vmatprep.subr.bf16.mxu1 %v2218_v8  ;;  %v1939_v8 = vld [vmem:[#allocation2] ss:$0 sm:$0xff] }
 0x9e8   :  { %2004 = vmatpush3.bf16.msra.mxu1 %v2219_v9 }
 0x9e9   :  { %2005 = vmatprep.subr.bf16.mxu1 %v2220_v35 }
 0x9ec   :  { %2006 = vmatpush3.bf16.msra.mxu1 %v2221_v37 }
 0x9ed   :  { %2007 = vmatprep.subr.bf16.mxu1 %v2222_v38 }
 0x9f0   :  { %2008 = vmatpush3.bf16.msra.mxu1 %v2223_v39 }
 0x9f1   :  { %2009 = vmatprep.subr.bf16.mxu1 %v2224_v36 }
 0x9f4   :  { %2010 = vmatpush3.bf16.msra.mxu1 %v2225_v41 }
 0x9f5   :  { %2011 = vmatprep.subr.bf16.mxu1 %v2226_v43 }
 0x9f8   :  { %2012 = vmatpush3.bf16.msra.mxu1 %v2227_v46 }
 0xaae   :  { %v1453_v14 = vpop.f32.mrb[24].mxu1 }
 0xaaf   :  { %v1454_v15 = vadd.f32 %v1453_v14, %v1390_v13  ;;  %v2146_v17 = vpop.f32.mrb[25].mxu1 }
 0xab0   :  { %v1456_v18 = vpop.f32.mrb[26].mxu1 }
 0xab1   :  { %v1914_v20 = vmul.f32 -1.442695, %v1454_v15  ;;  %v2147_v21 = vpop.f32.mrb[27].mxu1 }
 0xab3   :  { %2272 = vpow2.f32 %v1914_v20 }
 0xab4   :  { %2274 = vrcp.f32 %v1469_v23 }
 0xabd   :  { %v2273_v24 = vpop.eup %2272 }
 0xabe   :  { %v1462_v25 = vadd.f32 1.0, %v2273_v24  ;;  %v2275_v10 = vpop.eup %2274 }
 0xac0   :  { %2276 = vrcp.f32 %v1462_v25 }
 0xaca   :  { %v2277_v27 = vpop.eup %2276 }
 0xacb   :  { %v1483_v28 = vrot.slane %v2277_v27, %v2524_v63  ;;  %v2232_v63 = vld [vmem:[%s2803_s24 + $0x20] sm:$0xff]  }
 0xacd   :  { %v1484_v29 = vsub.f32 %v1483_v28, %v2275_v10 }
 0xacf   :  { %v1490_v32 = vmul.f32 %v1488_v30, %v1484_v29 }
 0xad1   :  { %v1492_v33 = vmul.f32 %v1491_v31, %v1490_v32 }
 0xad3   :  { %v1497_v34 = vpack.c.bf16 %v1492_v33, %v1492_v33 }
 0xad5   :  { %1921 = vmatmul.mubr.msk.bf16.vlgmr.msra.gmra.mrb[24].mxu0 %vm718_vm1, %v1497_v34 }
 0xad6   :  { %2164 = vmatprep.mubr.msk.bf16.mxu0 %vm2291_vm0, %v2289_v5  ;;  %2149 = vmatpush3.bf16.msra.mxu0 %v2228_v44  ;;  %vm1872_vm0 = vcmask 5120  }
 0xad7   :  { %2150 = vmatprep.subr.bf16.mxu0 %v2289_v5 }
 0xada   :  { %2151 = vmatpush3.bf16.msra.mxu0 %v2229_v45 }
 0xadb   :  { %2152 = vmatprep.subr.bf16.mxu0 %v2289_v5 }
 0xade   :  { %2153 = vmatpush3.bf16.msra.mxu0 %v2230_v47 }
 0xadf   :  { %2154 = vmatprep.subr.bf16.mxu0 %v2289_v5 }
 0xae2   :  { %2155 = vmatpush3.bf16.msra.mxu0 %v2231_v19 }
 0xae3   :  { %2156 = vmatprep.subr.bf16.mxu0 %v2289_v5 }
 0xae6   :  { %2157 = vmatpush3.bf16.msra.mxu0 %v2232_v63 }
 0xae7   :  { %2158 = vmatprep.subr.bf16.mxu0 %v2289_v5 }
 0xaea   :  { %2159 = vmatpush3.bf16.msra.mxu0 %v2233_v60 }
 0xaeb   :  { %2160 = vmatprep.subr.bf16.mxu0 %v2289_v5 }
 0xaee   :  { %2161 = vmatpush3.bf16.msra.mxu0 %v2234_v26 }
 0xaef   :  { %2162 = vmatprep.subr.bf16.mxu0 %v2289_v5 }
 0xaf2   :  { %2163 = vmatpush3.bf16.msra.mxu0 %v2235_v61 }
 0xba8   :  { %v1567_v52 = vpop.f32.mrb[24].mxu0 }
 0xba9   :  { %v1568_v53 = vadd.f32 %v1567_v52, %v1503_v50  ;;  %v1569_v54 = vpop.f32.mrb[25].mxu0 }
 0xbaa   :  { %v1570_v55 = vadd.f32 %v1569_v54, %v1507_v51  ;;  %v1571_v42 = vpop.f32.mrb[26].mxu0 }
 0xbab   :  { %2278 = vtanh.f32 %v1568_v53  ;;  %v1572_v56 = vpop.f32.mrb[27].mxu0 }
 0xbac   :  { %2280 = vtanh.f32 %v1570_v55 }
 0xbb5   :  { %v2279_v40 = vpop.eup %2278 }
 0xbb6   :  { %v2281_v57 = vpop.eup %2280  ;;  %v1608_v59 = vpack.c.bf16 %v2279_v40, %v2279_v40 }
 0xbb7   :  { %v1609_v58 = vpack.c.bf16 %v2281_v57, %v2281_v57 }
 0xbb9   :  { %1745 = vmatprep.mubr.bf16.mxu1 %v1609_v58 }
 0xbba   :  { %1746 = vmatmul.mubr.bf16.vlgmr.msra.gmra.mrb[28].mxu1 %v1608_v59 }
 0xc8d   :  { %v2013_v16 = vpop.f32.mrb[28].mxu1 }
 0xc8e   :  { %v2014_v1 = vpop.f32.mrb[29].mxu1 }
 0xc8f   :  { %v2015_v2 = vadd.f32 %v2014_v1, %v2013_v16  ;;  %v2016_v3 = vpop.f32.mrb[30].mxu1 }
 0xc90   :  { %v2017_v4 = vpop.f32.mrb[31].mxu1 }
 0xc91   :  { %v1748_v5 = vadd.f32 %v2015_v2, %v1922_v62 }
 0xc93   :  { %2282 = vtanh.f32 %v1748_v5 }
 0xc9d   :  { %v2283_v6 = vpop.eup %2282 }
 0xc9e   :  { %v1770_v7 = vpack.c.bf16 %v2283_v6, %v2283_v6 }
 0xca0   :  { %2165 = vmatmul.mubr.bf16.vlgmr.msra.gmra.mrb[28].mxu0 %v1770_v7 }
 0xd73   :  { %v1860_v9 = vpop.f32.mrb[28].mxu0 }
 0xd74   :  { %v1861_v11 = vadd.f32 %v1939_v8, %v1860_v9  ;;  %v2166_v12 = vpop.f32.mrb[29].mxu0 }
 0xd75   :  { %v1863_v13 = vpop.f32.mrb[30].mxu0 }
 0xd76   :  { %v1948_v14 = vmul.f32 -1.442695, %v1861_v11  ;;  %v2167_v15 = vpop.f32.mrb[31].mxu0 }
 0xd78   :  { %2284 = vpow2.f32 %v1948_v14 }
 0xd82   :  { %v2285_v17 = vpop.eup %2284 }
 0xd83   :  { %v1869_v18 = vadd.f32 1.0, %v2285_v17 }
 0xd85   :  { %2286 = vrcp.f32 %v1869_v18 }
 0xd8f   :  { %v2287_v20 = vpop.eup %2286 }
 0xd90   :  { %1873 = vst.msk [vmem:[%s2807_s26] sm:$0x3f] %vm1872_vm0, %v2287_v20 }

</bundles_post_ra>
